<compile_context>
chip_gen: v6e
topology: v6e:2x2x1
jax: 0.10.0
libtpu: 0.0.40
codegen_flags: <defaults>
</compile_context>

<pallas_src>
import jax
import jax.numpy as jnp
from jax.experimental import pallas as pl
from jax.experimental.pallas import tpu as pltpu


# (weight index, sign) for output multivector component j, input component k.
# This is exactly the block structure of get_clifford_linear_kernel_2d:
#   kernel1 rows: [w0,  w1,  w2, -w3]
#   kernel2 rows: [w1,  w0, -w3,  w2]
#   kernel3 rows: [w2,  w3,  w0, -w1]
#   kernel4 rows: [w3,  w2, -w1,  w0]
_CLIFFORD_STRUCT = (
    ((0, +1), (1, +1), (2, +1), (3, -1)),
    ((1, +1), (0, +1), (3, -1), (2, +1)),
    ((2, +1), (3, +1), (0, +1), (1, -1)),
    ((3, +1), (2, +1), (1, -1), (0, +1)),
)


# ----------------------------------------------------------------------------
# Pallas kernel: Clifford geometric-product weight multiplication, lane-dense
# over the Fourier-mode axis.
# ----------------------------------------------------------------------------
def _clifford_batchmul_kernel(x_ref, w_ref, o_ref):
    """x_ref: (4, B, Cin, T)  w_ref: (4, Cin, Cout, T)  o_ref: (4, B, Cout, T)

    out[j, b, o, t] = sum_k sum_i sign(j,k) * x[k, b, i, t] * w[p(j,k), i, o, t]
    """
    x = x_ref[...]
    w = w_ref[...]
    _, B, Cin, T = x.shape
    Cout = w.shape[2]

    for j in range(4):                       # output multivector component
        acc = None
        for k in range(4):                   # input multivector component
            widx, sgn = _CLIFFORD_STRUCT[j][k]
            xk = x[k]                        # (B, Cin, T)
            wk = w[widx]                     # (Cin, Cout, T)
            for i in range(Cin):             # channel contraction: VPU MAC over lanes
                contrib = xk[:, i][:, None, :] * wk[i][None, :, :]   # (B, Cout, T)
                if acc is None:
                    acc = contrib if sgn > 0 else -contrib
                elif sgn > 0:
                    acc = acc + contrib
                else:
                    acc = acc - contrib
        o_ref[j] = acc


def _pick_xy_tile(B, Cin, Cout, XY):
    """Choose the lane tile over the flattened mode axis.

    Keeps the double-buffered working set small enough for every TPU
    generation's default scoped VMEM limit (incl. v7x's smaller VMEM)."""
    bytes_per_lane = 4 * (4 * B * Cin + 4 * Cin * Cout + 4 * B * Cout)
    budget = 8 * 1024 * 1024
    max_lanes = max(128, budget // (2 * bytes_per_lane))
    if XY <= max_lanes:
        return XY, XY                        # single grid step, block == full extent
    tile = max(128, min(4096, (max_lanes // 128) * 128))
    xy_pad = ((XY + tile - 1) // tile) * tile
    return tile, xy_pad


def clifford_batchmul_pallas(x, w):
    """Clifford geometric-product spectral multiply.

    x: (4, B, Cin, XY) float32   w: (4, Cin, Cout, XY) float32
    returns (4, B, Cout, XY) float32
    """
    _, B, Cin, XY = x.shape
    Cout = w.shape[2]
    tile, xy_pad = _pick_xy_tile(B, Cin, Cout, XY)
    if xy_pad != XY:
        pad = xy_pad - XY
        x = jnp.pad(x, ((0, 0), (0, 0), (0, 0), (0, pad)))
        w = jnp.pad(w, ((0, 0), (0, 0), (0, 0), (0, pad)))
    n_steps = xy_pad // tile

    out = pl.pallas_call(
        _clifford_batchmul_kernel,
        out_shape=jax.ShapeDtypeStruct((4, B, Cout, xy_pad), jnp.float32),
        grid_spec=pltpu.PrefetchScalarGridSpec(
            num_scalar_prefetch=0,
            grid=(n_steps,),
            in_specs=[
                pl.BlockSpec((4, B, Cin, tile), lambda t: (0, 0, 0, t)),
                pl.BlockSpec((4, Cin, Cout, tile), lambda t: (0, 0, 0, t)),
            ],
            out_specs=pl.BlockSpec((4, B, Cout, tile), lambda t: (0, 0, 0, t)),
        ),
        compiler_params=pltpu.CompilerParams(
            # Fourier modes are fully independent: shard across TCs on v7x.
            dimension_semantics=("parallel",),
        ),
    )(x, w)

    if xy_pad != XY:
        out = out[..., :XY]
    return out


# ----------------------------------------------------------------------------
# JAX glue: FFT, corner gather/scatter, component packing.
# ----------------------------------------------------------------------------
def _gather_corners(a, m1, m2):
    top = jnp.concatenate([a[..., :m1, :m2], a[..., :m1, -m2:]], axis=-1)
    bot = jnp.concatenate([a[..., -m1:, :m2], a[..., -m1:, -m2:]], axis=-1)
    return jnp.concatenate([top, bot], axis=-2)


def _scatter_corners(c, m1, m2, H, W):
    B, C = c.shape[0], c.shape[1]
    full = jnp.zeros((B, C, H, W), dtype=c.dtype)
    full = full.at[:, :, :m1, :m2].set(c[:, :, :m1, :m2])
    full = full.at[:, :, :m1, -m2:].set(c[:, :, :m1, m2:])
    full = full.at[:, :, -m1:, :m2].set(c[:, :, m1:, :m2])
    full = full.at[:, :, -m1:, -m2:].set(c[:, :, m1:, m2:])
    return full


def clifford_spectral_conv2d(vector, spinor, weights, modes1, modes2):
    """Matches CliffordSpectralConv2d_deprecated.forward (complex outputs)."""
    B, Cin, H, W = vector.shape
    Cout = weights.shape[2]
    m1, m2 = modes1, modes2
    XY = (2 * m1) * (2 * m2)

    # TODO(synk): fft2/ifft2 have no clean Pallas TPU equivalent; done with jnp.fft.
    vector_ft = jnp.fft.fft2(vector)
    spinor_ft = jnp.fft.fft2(spinor)

    # Corner-first gather: never materializes the full (B, 4Cin, H, W) multivector.
    v_c = _gather_corners(vector_ft, m1, m2)   # (B, Cin, 2m1, 2m2) complex64
    s_c = _gather_corners(spinor_ft, m1, m2)

    # Component-major multivector (4, B, Cin, XY) — pure stack/reshape, no transposes.
    x = jnp.stack([s_c.real, v_c.real, v_c.imag, s_c.imag], axis=0)
    x = x.reshape(4, B, Cin, XY).astype(jnp.float32)
    w = weights.reshape(4, Cin, Cout, XY).astype(jnp.float32)

    out = clifford_batchmul_pallas(x, w)                   # (4, B, Cout, XY)
    out = out.reshape(4, B, Cout, 2 * m1, 2 * m2)

    out_vec_c = out[1] + 1j * out[2]                       # (B, Cout, 2m1, 2m2)
    out_spin_c = out[0] + 1j * out[3]

    out_vec_ft = _scatter_corners(out_vec_c, m1, m2, H, W)
    out_spin_ft = _scatter_corners(out_spin_c, m1, m2, H, W)

    vector_out = jnp.fft.ifft2(out_vec_ft, s=(H, W))
    spinor_out = jnp.fft.ifft2(out_spin_ft, s=(H, W))
    return vector_out, spinor_out


# ----------------------------------------------------------------------------
# Pure-JAX references (mirror the PyTorch module exactly) for validation.
# ----------------------------------------------------------------------------
def _full_clifford_kernel(weights):
    w0, w1, w2, w3 = weights[0], weights[1], weights[2], weights[3]
    k1 = jnp.concatenate([w0, w1, w2, -w3], axis=0)
    k2 = jnp.concatenate([w1, w0, -w3, w2], axis=0)
    k3 = jnp.concatenate([w2, w3, w0, -w1], axis=0)
    k4 = jnp.concatenate([w3, w2, -w1, w0], axis=0)
    return jnp.concatenate([k1, k2, k3, k4], axis=1)


def _reference_forward(vector, spinor, weights, m1, m2):
    B, Cin, H, W = vector.shape
    vft = jnp.fft.fft2(vector)
    sft = jnp.fft.fft2(spinor)
    mv = jnp.concatenate([sft.real, vft.real, vft.imag, sft.imag], axis=1)
    top = jnp.concatenate([mv[:, :, :m1, :m2], mv[:, :, :m1, -m2:]], axis=-1)
    bot = jnp.concatenate([mv[:, :, -m1:, :m2], mv[:, :, -m1:, -m2:]], axis=-1)
    inp = jnp.concatenate([top, bot], axis=-2)
    kernel = _full_clifford_kernel(weights)
    output = jnp.einsum("bixy,ioxy->boxy", inp, kernel)
    out_ft = jnp.zeros((B, kernel.shape[1], H, W), jnp.float32)
    out_ft = out_ft.at[:, :, :m1, :m2].set(output[:, :, :m1, :m2])
    out_ft = out_ft.at[:, :, -m1:, :m2].set(output[:, :, -m1:, :m2])
    out_ft = out_ft.at[:, :, :m1, -m2:].set(output[:, :, :m1, -m2:])
    out_ft = out_ft.at[:, :, -m1:, -m2:].set(output[:, :, -m1:, -m2:])
    out_ft = out_ft.reshape(B, 4, -1, H, W)
    ovft = out_ft[:, 1] + 1j * out_ft[:, 2]
    osft = out_ft[:, 0] + 1j * out_ft[:, 3]
    return jnp.fft.ifft2(ovft, s=(H, W)), jnp.fft.ifft2(osft, s=(H, W))


if __name__ == "__main__":
    # Small shapes consistent with the module (Cin == Cout required by the module's math).
    B, Cin, Cout = 2, 4, 4
    H = W = 16
    modes1 = modes2 = 4

    key = jax.random.PRNGKey(0)
    k_v, k_s, k_w = jax.random.split(key, 3)

    vector = jax.random.normal(k_v, (B, Cin, H, W), dtype=jnp.float32)
    spinor = jax.random.normal(k_s, (B, Cin, H, W), dtype=jnp.float32)

    # scale * torch.rand(4, Cin, Cout, 2*modes1, 2*modes2)
    scale = 1.0 / (Cin * Cout)
    weights = scale * jax.random.uniform(
        k_w, (4, Cin, Cout, 2 * modes1, 2 * modes2), dtype=jnp.float32
    )

    fwd = jax.jit(clifford_spectral_conv2d, static_argnums=(3, 4))
    vec_out, spin_out = fwd(vector, spinor, weights, modes1, modes2)
    jax.block_until_ready(vec_out)
    jax.block_until_ready(spin_out)

    # --- check 1: Pallas hot path vs the original concatenated-kernel einsum ---
    m1, m2 = modes1, modes2
    XY = (2 * m1) * (2 * m2)
    vft = jnp.fft.fft2(vector)
    sft = jnp.fft.fft2(spinor)
    v_c = _gather_corners(vft, m1, m2)
    s_c = _gather_corners(sft, m1, m2)
    x4 = jnp.stack([s_c.real, v_c.real, v_c.imag, s_c.imag], axis=0).reshape(4, B, Cin, XY)
    w4 = weights.reshape(4, Cin, Cout, XY)

    got4 = clifford_batchmul_pallas(x4, w4)                       # (4, B, Cout, XY)
    inp_ref = jnp.transpose(x4, (1, 0, 2, 3)).reshape(B, 4 * Cin, XY)
    ker_ref = _full_clifford_kernel(w4)                           # (4Cin, 4Cout, XY)
    want = jnp.einsum("bix,iox->box", inp_ref, ker_ref)
    got_flat = jnp.transpose(got4, (1, 0, 2, 3)).reshape(B, 4 * Cout, XY)
    assert jnp.allclose(got_flat, want, atol=1e-4, rtol=1e-4), "Pallas hot path mismatch"

    # --- check 2: full forward vs pure-JAX replica of the PyTorch module ---
    ref_vec, ref_spin = _reference_forward(vector, spinor, weights, modes1, modes2)
    assert jnp.allclose(vec_out, ref_vec, atol=1e-4, rtol=1e-4), "vector output mismatch"
    assert jnp.allclose(spin_out, ref_spin, atol=1e-4, rtol=1e-4), "spinor output mismatch"

    print("KERNEL_OK")
</pallas_src>

<mosaic_0001>
module attributes {stable_mosaic.version = 11 : i64} {
  func.func @_clifford_batchmul_kernel(%arg0: i32, %arg1: memref<4x2x4x64xf32, #tpu.memory_space<vmem>>, %arg2: memref<4x4x4x64xf32, #tpu.memory_space<vmem>>, %arg3: memref<4x2x4x64xf32, #tpu.memory_space<vmem>>) attributes {dimension_semantics = [#tpu.dimension_semantics<parallel>], iteration_bounds = array<i64: 1>, scalar_prefetch = 0 : i64, scratch_operands = 0 : i64, tpu.core_type = #tpu.core_type<tc>, window_params = [{transform_indices = @transform_0, window_bounds = array<i64: 4, 2, 4, 64>}, {transform_indices = @transform_1, window_bounds = array<i64: 4, 4, 4, 64>}, {transform_indices = @transform_2, window_bounds = array<i64: 4, 2, 4, 64>}]} {
    %c0 = arith.constant 0 : index
    %c0_0 = arith.constant 0 : index
    %c0_1 = arith.constant 0 : index
    %c0_2 = arith.constant 0 : index
    %0 = vector.load %arg1[%c0, %c0_0, %c0_1, %c0_2] : memref<4x2x4x64xf32, #tpu.memory_space<vmem>>, vector<4x2x4x64xf32>
    %c0_3 = arith.constant 0 : index
    %c0_4 = arith.constant 0 : index
    %c0_5 = arith.constant 0 : index
    %c0_6 = arith.constant 0 : index
    %1 = vector.load %arg2[%c0_3, %c0_4, %c0_5, %c0_6] : memref<4x4x4x64xf32, #tpu.memory_space<vmem>>, vector<4x4x4x64xf32>
    %2 = vector.extract_strided_slice %0 {offsets = [0, 0, 0, 0], sizes = [1, 2, 4, 64], strides = [1, 1, 1, 1]} : vector<4x2x4x64xf32> to vector<1x2x4x64xf32>
    %3 = vector.shape_cast %2 : vector<1x2x4x64xf32> to vector<2x4x64xf32>
    %4 = vector.extract_strided_slice %1 {offsets = [0, 0, 0, 0], sizes = [1, 4, 4, 64], strides = [1, 1, 1, 1]} : vector<4x4x4x64xf32> to vector<1x4x4x64xf32>
    %5 = vector.shape_cast %4 : vector<1x4x4x64xf32> to vector<4x4x64xf32>
    %6 = vector.extract_strided_slice %3 {offsets = [0, 0, 0], sizes = [2, 1, 64], strides = [1, 1, 1]} : vector<2x4x64xf32> to vector<2x1x64xf32>
    %7 = vector.shape_cast %6 : vector<2x1x64xf32> to vector<2x64xf32>
    %8 = vector.shape_cast %7 : vector<2x64xf32> to vector<2x1x64xf32>
    %9 = vector.extract_strided_slice %5 {offsets = [0, 0, 0], sizes = [1, 4, 64], strides = [1, 1, 1]} : vector<4x4x64xf32> to vector<1x4x64xf32>
    %10 = vector.shape_cast %9 : vector<1x4x64xf32> to vector<4x64xf32>
    %11 = vector.shape_cast %10 : vector<4x64xf32> to vector<1x4x64xf32>
    %12 = vector.broadcast %8 : vector<2x1x64xf32> to vector<2x4x64xf32>
    %13 = vector.broadcast %11 : vector<1x4x64xf32> to vector<2x4x64xf32>
    %14 = arith.mulf %12, %13 : vector<2x4x64xf32>
    %15 = vector.extract_strided_slice %3 {offsets = [0, 1, 0], sizes = [2, 1, 64], strides = [1, 1, 1]} : vector<2x4x64xf32> to vector<2x1x64xf32>
    %16 = vector.shape_cast %15 : vector<2x1x64xf32> to vector<2x64xf32>
    %17 = vector.shape_cast %16 : vector<2x64xf32> to vector<2x1x64xf32>
    %18 = vector.extract_strided_slice %5 {offsets = [1, 0, 0], sizes = [1, 4, 64], strides = [1, 1, 1]} : vector<4x4x64xf32> to vector<1x4x64xf32>
    %19 = vector.shape_cast %18 : vector<1x4x64xf32> to vector<4x64xf32>
    %20 = vector.shape_cast %19 : vector<4x64xf32> to vector<1x4x64xf32>
    %21 = vector.broadcast %17 : vector<2x1x64xf32> to vector<2x4x64xf32>
    %22 = vector.broadcast %20 : vector<1x4x64xf32> to vector<2x4x64xf32>
    %23 = arith.mulf %21, %22 : vector<2x4x64xf32>
    %24 = arith.addf %14, %23 : vector<2x4x64xf32>
    %25 = vector.extract_strided_slice %3 {offsets = [0, 2, 0], sizes = [2, 1, 64], strides = [1, 1, 1]} : vector<2x4x64xf32> to vector<2x1x64xf32>
    %26 = vector.shape_cast %25 : vector<2x1x64xf32> to vector<2x64xf32>
    %27 = vector.shape_cast %26 : vector<2x64xf32> to vector<2x1x64xf32>
    %28 = vector.extract_strided_slice %5 {offsets = [2, 0, 0], sizes = [1, 4, 64], strides = [1, 1, 1]} : vector<4x4x64xf32> to vector<1x4x64xf32>
    %29 = vector.shape_cast %28 : vector<1x4x64xf32> to vector<4x64xf32>
    %30 = vector.shape_cast %29 : vector<4x64xf32> to vector<1x4x64xf32>
    %31 = vector.broadcast %27 : vector<2x1x64xf32> to vector<2x4x64xf32>
    %32 = vector.broadcast %30 : vector<1x4x64xf32> to vector<2x4x64xf32>
    %33 = arith.mulf %31, %32 : vector<2x4x64xf32>
    %34 = arith.addf %24, %33 : vector<2x4x64xf32>
    %35 = vector.extract_strided_slice %3 {offsets = [0, 3, 0], sizes = [2, 1, 64], strides = [1, 1, 1]} : vector<2x4x64xf32> to vector<2x1x64xf32>
    %36 = vector.shape_cast %35 : vector<2x1x64xf32> to vector<2x64xf32>
    %37 = vector.shape_cast %36 : vector<2x64xf32> to vector<2x1x64xf32>
    %38 = vector.extract_strided_slice %5 {offsets = [3, 0, 0], sizes = [1, 4, 64], strides = [1, 1, 1]} : vector<4x4x64xf32> to vector<1x4x64xf32>
    %39 = vector.shape_cast %38 : vector<1x4x64xf32> to vector<4x64xf32>
    %40 = vector.shape_cast %39 : vector<4x64xf32> to vector<1x4x64xf32>
    %41 = vector.broadcast %37 : vector<2x1x64xf32> to vector<2x4x64xf32>
    %42 = vector.broadcast %40 : vector<1x4x64xf32> to vector<2x4x64xf32>
    %43 = arith.mulf %41, %42 : vector<2x4x64xf32>
    %44 = arith.addf %34, %43 : vector<2x4x64xf32>
    %45 = vector.extract_strided_slice %0 {offsets = [1, 0, 0, 0], sizes = [1, 2, 4, 64], strides = [1, 1, 1, 1]} : vector<4x2x4x64xf32> to vector<1x2x4x64xf32>
    %46 = vector.shape_cast %45 : vector<1x2x4x64xf32> to vector<2x4x64xf32>
    %47 = vector.extract_strided_slice %1 {offsets = [1, 0, 0, 0], sizes = [1, 4, 4, 64], strides = [1, 1, 1, 1]} : vector<4x4x4x64xf32> to vector<1x4x4x64xf32>
    %48 = vector.shape_cast %47 : vector<1x4x4x64xf32> to vector<4x4x64xf32>
    %49 = vector.extract_strided_slice %46 {offsets = [0, 0, 0], sizes = [2, 1, 64], strides = [1, 1, 1]} : vector<2x4x64xf32> to vector<2x1x64xf32>
    %50 = vector.shape_cast %49 : vector<2x1x64xf32> to vector<2x64xf32>
    %51 = vector.shape_cast %50 : vector<2x64xf32> to vector<2x1x64xf32>
    %52 = vector.extract_strided_slice %48 {offsets = [0, 0, 0], sizes = [1, 4, 64], strides = [1, 1, 1]} : vector<4x4x64xf32> to vector<1x4x64xf32>
    %53 = vector.shape_cast %52 : vector<1x4x64xf32> to vector<4x64xf32>
    %54 = vector.shape_cast %53 : vector<4x64xf32> to vector<1x4x64xf32>
    %55 = vector.broadcast %51 : vector<2x1x64xf32> to vector<2x4x64xf32>
    %56 = vector.broadcast %54 : vector<1x4x64xf32> to vector<2x4x64xf32>
    %57 = arith.mulf %55, %56 : vector<2x4x64xf32>
    %58 = arith.addf %44, %57 : vector<2x4x64xf32>
    %59 = vector.extract_strided_slice %46 {offsets = [0, 1, 0], sizes = [2, 1, 64], strides = [1, 1, 1]} : vector<2x4x64xf32> to vector<2x1x64xf32>
    %60 = vector.shape_cast %59 : vector<2x1x64xf32> to vector<2x64xf32>
    %61 = vector.shape_cast %60 : vector<2x64xf32> to vector<2x1x64xf32>
    %62 = vector.extract_strided_slice %48 {offsets = [1, 0, 0], sizes = [1, 4, 64], strides = [1, 1, 1]} : vector<4x4x64xf32> to vector<1x4x64xf32>
    %63 = vector.shape_cast %62 : vector<1x4x64xf32> to vector<4x64xf32>
    %64 = vector.shape_cast %63 : vector<4x64xf32> to vector<1x4x64xf32>
    %65 = vector.broadcast %61 : vector<2x1x64xf32> to vector<2x4x64xf32>
    %66 = vector.broadcast %64 : vector<1x4x64xf32> to vector<2x4x64xf32>
    %67 = arith.mulf %65, %66 : vector<2x4x64xf32>
    %68 = arith.addf %58, %67 : vector<2x4x64xf32>
    %69 = vector.extract_strided_slice %46 {offsets = [0, 2, 0], sizes = [2, 1, 64], strides = [1, 1, 1]} : vector<2x4x64xf32> to vector<2x1x64xf32>
    %70 = vector.shape_cast %69 : vector<2x1x64xf32> to vector<2x64xf32>
    %71 = vector.shape_cast %70 : vector<2x64xf32> to vector<2x1x64xf32>
    %72 = vector.extract_strided_slice %48 {offsets = [2, 0, 0], sizes = [1, 4, 64], strides = [1, 1, 1]} : vector<4x4x64xf32> to vector<1x4x64xf32>
    %73 = vector.shape_cast %72 : vector<1x4x64xf32> to vector<4x64xf32>
    %74 = vector.shape_cast %73 : vector<4x64xf32> to vector<1x4x64xf32>
    %75 = vector.broadcast %71 : vector<2x1x64xf32> to vector<2x4x64xf32>
    %76 = vector.broadcast %74 : vector<1x4x64xf32> to vector<2x4x64xf32>
    %77 = arith.mulf %75, %76 : vector<2x4x64xf32>
    %78 = arith.addf %68, %77 : vector<2x4x64xf32>
    %79 = vector.extract_strided_slice %46 {offsets = [0, 3, 0], sizes = [2, 1, 64], strides = [1, 1, 1]} : vector<2x4x64xf32> to vector<2x1x64xf32>
    %80 = vector.shape_cast %79 : vector<2x1x64xf32> to vector<2x64xf32>
    %81 = vector.shape_cast %80 : vector<2x64xf32> to vector<2x1x64xf32>
    %82 = vector.extract_strided_slice %48 {offsets = [3, 0, 0], sizes = [1, 4, 64], strides = [1, 1, 1]} : vector<4x4x64xf32> to vector<1x4x64xf32>
    %83 = vector.shape_cast %82 : vector<1x4x64xf32> to vector<4x64xf32>
    %84 = vector.shape_cast %83 : vector<4x64xf32> to vector<1x4x64xf32>
    %85 = vector.broadcast %81 : vector<2x1x64xf32> to vector<2x4x64xf32>
    %86 = vector.broadcast %84 : vector<1x4x64xf32> to vector<2x4x64xf32>
    %87 = arith.mulf %85, %86 : vector<2x4x64xf32>
    %88 = arith.addf %78, %87 : vector<2x4x64xf32>
    %89 = vector.extract_strided_slice %0 {offsets = [2, 0, 0, 0], sizes = [1, 2, 4, 64], strides = [1, 1, 1, 1]} : vector<4x2x4x64xf32> to vector<1x2x4x64xf32>
    %90 = vector.shape_cast %89 : vector<1x2x4x64xf32> to vector<2x4x64xf32>
    %91 = vector.extract_strided_slice %1 {offsets = [2, 0, 0, 0], sizes = [1, 4, 4, 64], strides = [1, 1, 1, 1]} : vector<4x4x4x64xf32> to vector<1x4x4x64xf32>
    %92 = vector.shape_cast %91 : vector<1x4x4x64xf32> to vector<4x4x64xf32>
    %93 = vector.extract_strided_slice %90 {offsets = [0, 0, 0], sizes = [2, 1, 64], strides = [1, 1, 1]} : vector<2x4x64xf32> to vector<2x1x64xf32>
    %94 = vector.shape_cast %93 : vector<2x1x64xf32> to vector<2x64xf32>
    %95 = vector.shape_cast %94 : vector<2x64xf32> to vector<2x1x64xf32>
    %96 = vector.extract_strided_slice %92 {offsets = [0, 0, 0], sizes = [1, 4, 64], strides = [1, 1, 1]} : vector<4x4x64xf32> to vector<1x4x64xf32>
    %97 = vector.shape_cast %96 : vector<1x4x64xf32> to vector<4x64xf32>
    %98 = vector.shape_cast %97 : vector<4x64xf32> to vector<1x4x64xf32>
    %99 = vector.broadcast %95 : vector<2x1x64xf32> to vector<2x4x64xf32>
    %100 = vector.broadcast %98 : vector<1x4x64xf32> to vector<2x4x64xf32>
    %101 = arith.mulf %99, %100 : vector<2x4x64xf32>
    %102 = arith.addf %88, %101 : vector<2x4x64xf32>
    %103 = vector.extract_strided_slice %90 {offsets = [0, 1, 0], sizes = [2, 1, 64], strides = [1, 1, 1]} : vector<2x4x64xf32> to vector<2x1x64xf32>
    %104 = vector.shape_cast %103 : vector<2x1x64xf32> to vector<2x64xf32>
    %105 = vector.shape_cast %104 : vector<2x64xf32> to vector<2x1x64xf32>
    %106 = vector.extract_strided_slice %92 {offsets = [1, 0, 0], sizes = [1, 4, 64], strides = [1, 1, 1]} : vector<4x4x64xf32> to vector<1x4x64xf32>
    %107 = vector.shape_cast %106 : vector<1x4x64xf32> to vector<4x64xf32>
    %108 = vector.shape_cast %107 : vector<4x64xf32> to vector<1x4x64xf32>
    %109 = vector.broadcast %105 : vector<2x1x64xf32> to vector<2x4x64xf32>
    %110 = vector.broadcast %108 : vector<1x4x64xf32> to vector<2x4x64xf32>
    %111 = arith.mulf %109, %110 : vector<2x4x64xf32>
    %112 = arith.addf %102, %111 : vector<2x4x64xf32>
    %113 = vector.extract_strided_slice %90 {offsets = [0, 2, 0], sizes = [2, 1, 64], strides = [1, 1, 1]} : vector<2x4x64xf32> to vector<2x1x64xf32>
    %114 = vector.shape_cast %113 : vector<2x1x64xf32> to vector<2x64xf32>
    %115 = vector.shape_cast %114 : vector<2x64xf32> to vector<2x1x64xf32>
    %116 = vector.extract_strided_slice %92 {offsets = [2, 0, 0], sizes = [1, 4, 64], strides = [1, 1, 1]} : vector<4x4x64xf32> to vector<1x4x64xf32>
    %117 = vector.shape_cast %116 : vector<1x4x64xf32> to vector<4x64xf32>
    %118 = vector.shape_cast %117 : vector<4x64xf32> to vector<1x4x64xf32>
    %119 = vector.broadcast %115 : vector<2x1x64xf32> to vector<2x4x64xf32>
    %120 = vector.broadcast %118 : vector<1x4x64xf32> to vector<2x4x64xf32>
    %121 = arith.mulf %119, %120 : vector<2x4x64xf32>
    %122 = arith.addf %112, %121 : vector<2x4x64xf32>
    %123 = vector.extract_strided_slice %90 {offsets = [0, 3, 0], sizes = [2, 1, 64], strides = [1, 1, 1]} : vector<2x4x64xf32> to vector<2x1x64xf32>
    %124 = vector.shape_cast %123 : vector<2x1x64xf32> to vector<2x64xf32>
    %125 = vector.shape_cast %124 : vector<2x64xf32> to vector<2x1x64xf32>
    %126 = vector.extract_strided_slice %92 {offsets = [3, 0, 0], sizes = [1, 4, 64], strides = [1, 1, 1]} : vector<4x4x64xf32> to vector<1x4x64xf32>
    %127 = vector.shape_cast %126 : vector<1x4x64xf32> to vector<4x64xf32>
    %128 = vector.shape_cast %127 : vector<4x64xf32> to vector<1x4x64xf32>
    %129 = vector.broadcast %125 : vector<2x1x64xf32> to vector<2x4x64xf32>
    %130 = vector.broadcast %128 : vector<1x4x64xf32> to vector<2x4x64xf32>
    %131 = arith.mulf %129, %130 : vector<2x4x64xf32>
    %132 = arith.addf %122, %131 : vector<2x4x64xf32>
    %133 = vector.extract_strided_slice %0 {offsets = [3, 0, 0, 0], sizes = [1, 2, 4, 64], strides = [1, 1, 1, 1]} : vector<4x2x4x64xf32> to vector<1x2x4x64xf32>
    %134 = vector.shape_cast %133 : vector<1x2x4x64xf32> to vector<2x4x64xf32>
    %135 = vector.extract_strided_slice %1 {offsets = [3, 0, 0, 0], sizes = [1, 4, 4, 64], strides = [1, 1, 1, 1]} : vector<4x4x4x64xf32> to vector<1x4x4x64xf32>
    %136 = vector.shape_cast %135 : vector<1x4x4x64xf32> to vector<4x4x64xf32>
    %137 = vector.extract_strided_slice %134 {offsets = [0, 0, 0], sizes = [2, 1, 64], strides = [1, 1, 1]} : vector<2x4x64xf32> to vector<2x1x64xf32>
    %138 = vector.shape_cast %137 : vector<2x1x64xf32> to vector<2x64xf32>
    %139 = vector.shape_cast %138 : vector<2x64xf32> to vector<2x1x64xf32>
    %140 = vector.extract_strided_slice %136 {offsets = [0, 0, 0], sizes = [1, 4, 64], strides = [1, 1, 1]} : vector<4x4x64xf32> to vector<1x4x64xf32>
    %141 = vector.shape_cast %140 : vector<1x4x64xf32> to vector<4x64xf32>
    %142 = vector.shape_cast %141 : vector<4x64xf32> to vector<1x4x64xf32>
    %143 = vector.broadcast %139 : vector<2x1x64xf32> to vector<2x4x64xf32>
    %144 = vector.broadcast %142 : vector<1x4x64xf32> to vector<2x4x64xf32>
    %145 = arith.mulf %143, %144 : vector<2x4x64xf32>
    %146 = arith.subf %132, %145 : vector<2x4x64xf32>
    %147 = vector.extract_strided_slice %134 {offsets = [0, 1, 0], sizes = [2, 1, 64], strides = [1, 1, 1]} : vector<2x4x64xf32> to vector<2x1x64xf32>
    %148 = vector.shape_cast %147 : vector<2x1x64xf32> to vector<2x64xf32>
    %149 = vector.shape_cast %148 : vector<2x64xf32> to vector<2x1x64xf32>
    %150 = vector.extract_strided_slice %136 {offsets = [1, 0, 0], sizes = [1, 4, 64], strides = [1, 1, 1]} : vector<4x4x64xf32> to vector<1x4x64xf32>
    %151 = vector.shape_cast %150 : vector<1x4x64xf32> to vector<4x64xf32>
    %152 = vector.shape_cast %151 : vector<4x64xf32> to vector<1x4x64xf32>
    %153 = vector.broadcast %149 : vector<2x1x64xf32> to vector<2x4x64xf32>
    %154 = vector.broadcast %152 : vector<1x4x64xf32> to vector<2x4x64xf32>
    %155 = arith.mulf %153, %154 : vector<2x4x64xf32>
    %156 = arith.subf %146, %155 : vector<2x4x64xf32>
    %157 = vector.extract_strided_slice %134 {offsets = [0, 2, 0], sizes = [2, 1, 64], strides = [1, 1, 1]} : vector<2x4x64xf32> to vector<2x1x64xf32>
    %158 = vector.shape_cast %157 : vector<2x1x64xf32> to vector<2x64xf32>
    %159 = vector.shape_cast %158 : vector<2x64xf32> to vector<2x1x64xf32>
    %160 = vector.extract_strided_slice %136 {offsets = [2, 0, 0], sizes = [1, 4, 64], strides = [1, 1, 1]} : vector<4x4x64xf32> to vector<1x4x64xf32>
    %161 = vector.shape_cast %160 : vector<1x4x64xf32> to vector<4x64xf32>
    %162 = vector.shape_cast %161 : vector<4x64xf32> to vector<1x4x64xf32>
    %163 = vector.broadcast %159 : vector<2x1x64xf32> to vector<2x4x64xf32>
    %164 = vector.broadcast %162 : vector<1x4x64xf32> to vector<2x4x64xf32>
    %165 = arith.mulf %163, %164 : vector<2x4x64xf32>
    %166 = arith.subf %156, %165 : vector<2x4x64xf32>
    %167 = vector.extract_strided_slice %134 {offsets = [0, 3, 0], sizes = [2, 1, 64], strides = [1, 1, 1]} : vector<2x4x64xf32> to vector<2x1x64xf32>
    %168 = vector.shape_cast %167 : vector<2x1x64xf32> to vector<2x64xf32>
    %169 = vector.shape_cast %168 : vector<2x64xf32> to vector<2x1x64xf32>
    %170 = vector.extract_strided_slice %136 {offsets = [3, 0, 0], sizes = [1, 4, 64], strides = [1, 1, 1]} : vector<4x4x64xf32> to vector<1x4x64xf32>
    %171 = vector.shape_cast %170 : vector<1x4x64xf32> to vector<4x64xf32>
    %172 = vector.shape_cast %171 : vector<4x64xf32> to vector<1x4x64xf32>
    %173 = vector.broadcast %169 : vector<2x1x64xf32> to vector<2x4x64xf32>
    %174 = vector.broadcast %172 : vector<1x4x64xf32> to vector<2x4x64xf32>
    %175 = arith.mulf %173, %174 : vector<2x4x64xf32>
    %176 = arith.subf %166, %175 : vector<2x4x64xf32>
    %c0_7 = arith.constant 0 : index
    %c0_8 = arith.constant 0 : index
    %c0_9 = arith.constant 0 : index
    %c0_10 = arith.constant 0 : index
    %177 = vector.load %arg3[%c0_7, %c0_8, %c0_9, %c0_10] : memref<4x2x4x64xf32, #tpu.memory_space<vmem>>, vector<1x2x4x64xf32>
    %178 = vector.shape_cast %177 : vector<1x2x4x64xf32> to vector<2x4x64xf32>
    %179 = vector.shape_cast %176 : vector<2x4x64xf32> to vector<1x2x4x64xf32>
    tpu.vector_store %arg3[%c0_7, %c0_8, %c0_9, %c0_10], %179 {strides = array<i32>} : memref<4x2x4x64xf32, #tpu.memory_space<vmem>>, vector<1x2x4x64xf32>,
    %180 = vector.extract_strided_slice %0 {offsets = [0, 0, 0, 0], sizes = [1, 2, 4, 64], strides = [1, 1, 1, 1]} : vector<4x2x4x64xf32> to vector<1x2x4x64xf32>
    %181 = vector.shape_cast %180 : vector<1x2x4x64xf32> to vector<2x4x64xf32>
    %182 = vector.extract_strided_slice %1 {offsets = [1, 0, 0, 0], sizes = [1, 4, 4, 64], strides = [1, 1, 1, 1]} : vector<4x4x4x64xf32> to vector<1x4x4x64xf32>
    %183 = vector.shape_cast %182 : vector<1x4x4x64xf32> to vector<4x4x64xf32>
    %184 = vector.extract_strided_slice %181 {offsets = [0, 0, 0], sizes = [2, 1, 64], strides = [1, 1, 1]} : vector<2x4x64xf32> to vector<2x1x64xf32>
    %185 = vector.shape_cast %184 : vector<2x1x64xf32> to vector<2x64xf32>
    %186 = vector.shape_cast %185 : vector<2x64xf32> to vector<2x1x64xf32>
    %187 = vector.extract_strided_slice %183 {offsets = [0, 0, 0], sizes = [1, 4, 64], strides = [1, 1, 1]} : vector<4x4x64xf32> to vector<1x4x64xf32>
    %188 = vector.shape_cast %187 : vector<1x4x64xf32> to vector<4x64xf32>
    %189 = vector.shape_cast %188 : vector<4x64xf32> to vector<1x4x64xf32>
    %190 = vector.broadcast %186 : vector<2x1x64xf32> to vector<2x4x64xf32>
    %191 = vector.broadcast %189 : vector<1x4x64xf32> to vector<2x4x64xf32>
    %192 = arith.mulf %190, %191 : vector<2x4x64xf32>
    %193 = vector.extract_strided_slice %181 {offsets = [0, 1, 0], sizes = [2, 1, 64], strides = [1, 1, 1]} : vector<2x4x64xf32> to vector<2x1x64xf32>
    %194 = vector.shape_cast %193 : vector<2x1x64xf32> to vector<2x64xf32>
    %195 = vector.shape_cast %194 : vector<2x64xf32> to vector<2x1x64xf32>
    %196 = vector.extract_strided_slice %183 {offsets = [1, 0, 0], sizes = [1, 4, 64], strides = [1, 1, 1]} : vector<4x4x64xf32> to vector<1x4x64xf32>
    %197 = vector.shape_cast %196 : vector<1x4x64xf32> to vector<4x64xf32>
    %198 = vector.shape_cast %197 : vector<4x64xf32> to vector<1x4x64xf32>
    %199 = vector.broadcast %195 : vector<2x1x64xf32> to vector<2x4x64xf32>
    %200 = vector.broadcast %198 : vector<1x4x64xf32> to vector<2x4x64xf32>
    %201 = arith.mulf %199, %200 : vector<2x4x64xf32>
    %202 = arith.addf %192, %201 : vector<2x4x64xf32>
    %203 = vector.extract_strided_slice %181 {offsets = [0, 2, 0], sizes = [2, 1, 64], strides = [1, 1, 1]} : vector<2x4x64xf32> to vector<2x1x64xf32>
    %204 = vector.shape_cast %203 : vector<2x1x64xf32> to vector<2x64xf32>
    %205 = vector.shape_cast %204 : vector<2x64xf32> to vector<2x1x64xf32>
    %206 = vector.extract_strided_slice %183 {offsets = [2, 0, 0], sizes = [1, 4, 64], strides = [1, 1, 1]} : vector<4x4x64xf32> to vector<1x4x64xf32>
    %207 = vector.shape_cast %206 : vector<1x4x64xf32> to vector<4x64xf32>
    %208 = vector.shape_cast %207 : vector<4x64xf32> to vector<1x4x64xf32>
    %209 = vector.broadcast %205 : vector<2x1x64xf32> to vector<2x4x64xf32>
    %210 = vector.broadcast %208 : vector<1x4x64xf32> to vector<2x4x64xf32>
    %211 = arith.mulf %209, %210 : vector<2x4x64xf32>
    %212 = arith.addf %202, %211 : vector<2x4x64xf32>
    %213 = vector.extract_strided_slice %181 {offsets = [0, 3, 0], sizes = [2, 1, 64], strides = [1, 1, 1]} : vector<2x4x64xf32> to vector<2x1x64xf32>
    %214 = vector.shape_cast %213 : vector<2x1x64xf32> to vector<2x64xf32>
    %215 = vector.shape_cast %214 : vector<2x64xf32> to vector<2x1x64xf32>
    %216 = vector.extract_strided_slice %183 {offsets = [3, 0, 0], sizes = [1, 4, 64], strides = [1, 1, 1]} : vector<4x4x64xf32> to vector<1x4x64xf32>
    %217 = vector.shape_cast %216 : vector<1x4x64xf32> to vector<4x64xf32>
    %218 = vector.shape_cast %217 : vector<4x64xf32> to vector<1x4x64xf32>
    %219 = vector.broadcast %215 : vector<2x1x64xf32> to vector<2x4x64xf32>
    %220 = vector.broadcast %218 : vector<1x4x64xf32> to vector<2x4x64xf32>
    %221 = arith.mulf %219, %220 : vector<2x4x64xf32>
    %222 = arith.addf %212, %221 : vector<2x4x64xf32>
    %223 = vector.extract_strided_slice %0 {offsets = [1, 0, 0, 0], sizes = [1, 2, 4, 64], strides = [1, 1, 1, 1]} : vector<4x2x4x64xf32> to vector<1x2x4x64xf32>
    %224 = vector.shape_cast %223 : vector<1x2x4x64xf32> to vector<2x4x64xf32>
    %225 = vector.extract_strided_slice %1 {offsets = [0, 0, 0, 0], sizes = [1, 4, 4, 64], strides = [1, 1, 1, 1]} : vector<4x4x4x64xf32> to vector<1x4x4x64xf32>
    %226 = vector.shape_cast %225 : vector<1x4x4x64xf32> to vector<4x4x64xf32>
    %227 = vector.extract_strided_slice %224 {offsets = [0, 0, 0], sizes = [2, 1, 64], strides = [1, 1, 1]} : vector<2x4x64xf32> to vector<2x1x64xf32>
    %228 = vector.shape_cast %227 : vector<2x1x64xf32> to vector<2x64xf32>
    %229 = vector.shape_cast %228 : vector<2x64xf32> to vector<2x1x64xf32>
    %230 = vector.extract_strided_slice %226 {offsets = [0, 0, 0], sizes = [1, 4, 64], strides = [1, 1, 1]} : vector<4x4x64xf32> to vector<1x4x64xf32>
    %231 = vector.shape_cast %230 : vector<1x4x64xf32> to vector<4x64xf32>
    %232 = vector.shape_cast %231 : vector<4x64xf32> to vector<1x4x64xf32>
    %233 = vector.broadcast %229 : vector<2x1x64xf32> to vector<2x4x64xf32>
    %234 = vector.broadcast %232 : vector<1x4x64xf32> to vector<2x4x64xf32>
    %235 = arith.mulf %233, %234 : vector<2x4x64xf32>
    %236 = arith.addf %222, %235 : vector<2x4x64xf32>
    %237 = vector.extract_strided_slice %224 {offsets = [0, 1, 0], sizes = [2, 1, 64], strides = [1, 1, 1]} : vector<2x4x64xf32> to vector<2x1x64xf32>
    %238 = vector.shape_cast %237 : vector<2x1x64xf32> to vector<2x64xf32>
    %239 = vector.shape_cast %238 : vector<2x64xf32> to vector<2x1x64xf32>
    %240 = vector.extract_strided_slice %226 {offsets = [1, 0, 0], sizes = [1, 4, 64], strides = [1, 1, 1]} : vector<4x4x64xf32> to vector<1x4x64xf32>
    %241 = vector.shape_cast %240 : vector<1x4x64xf32> to vector<4x64xf32>
    %242 = vector.shape_cast %241 : vector<4x64xf32> to vector<1x4x64xf32>
    %243 = vector.broadcast %239 : vector<2x1x64xf32> to vector<2x4x64xf32>
    %244 = vector.broadcast %242 : vector<1x4x64xf32> to vector<2x4x64xf32>
    %245 = arith.mulf %243, %244 : vector<2x4x64xf32>
    %246 = arith.addf %236, %245 : vector<2x4x64xf32>
    %247 = vector.extract_strided_slice %224 {offsets = [0, 2, 0], sizes = [2, 1, 64], strides = [1, 1, 1]} : vector<2x4x64xf32> to vector<2x1x64xf32>
    %248 = vector.shape_cast %247 : vector<2x1x64xf32> to vector<2x64xf32>
    %249 = vector.shape_cast %248 : vector<2x64xf32> to vector<2x1x64xf32>
    %250 = vector.extract_strided_slice %226 {offsets = [2, 0, 0], sizes = [1, 4, 64], strides = [1, 1, 1]} : vector<4x4x64xf32> to vector<1x4x64xf32>
    %251 = vector.shape_cast %250 : vector<1x4x64xf32> to vector<4x64xf32>
    %252 = vector.shape_cast %251 : vector<4x64xf32> to vector<1x4x64xf32>
    %253 = vector.broadcast %249 : vector<2x1x64xf32> to vector<2x4x64xf32>
    %254 = vector.broadcast %252 : vector<1x4x64xf32> to vector<2x4x64xf32>
    %255 = arith.mulf %253, %254 : vector<2x4x64xf32>
    %256 = arith.addf %246, %255 : vector<2x4x64xf32>
    %257 = vector.extract_strided_slice %224 {offsets = [0, 3, 0], sizes = [2, 1, 64], strides = [1, 1, 1]} : vector<2x4x64xf32> to vector<2x1x64xf32>
    %258 = vector.shape_cast %257 : vector<2x1x64xf32> to vector<2x64xf32>
    %259 = vector.shape_cast %258 : vector<2x64xf32> to vector<2x1x64xf32>
    %260 = vector.extract_strided_slice %226 {offsets = [3, 0, 0], sizes = [1, 4, 64], strides = [1, 1, 1]} : vector<4x4x64xf32> to vector<1x4x64xf32>
    %261 = vector.shape_cast %260 : vector<1x4x64xf32> to vector<4x64xf32>
    %262 = vector.shape_cast %261 : vector<4x64xf32> to vector<1x4x64xf32>
    %263 = vector.broadcast %259 : vector<2x1x64xf32> to vector<2x4x64xf32>
    %264 = vector.broadcast %262 : vector<1x4x64xf32> to vector<2x4x64xf32>
    %265 = arith.mulf %263, %264 : vector<2x4x64xf32>
    %266 = arith.addf %256, %265 : vector<2x4x64xf32>
    %267 = vector.extract_strided_slice %0 {offsets = [2, 0, 0, 0], sizes = [1, 2, 4, 64], strides = [1, 1, 1, 1]} : vector<4x2x4x64xf32> to vector<1x2x4x64xf32>
    %268 = vector.shape_cast %267 : vector<1x2x4x64xf32> to vector<2x4x64xf32>
    %269 = vector.extract_strided_slice %1 {offsets = [3, 0, 0, 0], sizes = [1, 4, 4, 64], strides = [1, 1, 1, 1]} : vector<4x4x4x64xf32> to vector<1x4x4x64xf32>
    %270 = vector.shape_cast %269 : vector<1x4x4x64xf32> to vector<4x4x64xf32>
    %271 = vector.extract_strided_slice %268 {offsets = [0, 0, 0], sizes = [2, 1, 64], strides = [1, 1, 1]} : vector<2x4x64xf32> to vector<2x1x64xf32>
    %272 = vector.shape_cast %271 : vector<2x1x64xf32> to vector<2x64xf32>
    %273 = vector.shape_cast %272 : vector<2x64xf32> to vector<2x1x64xf32>
    %274 = vector.extract_strided_slice %270 {offsets = [0, 0, 0], sizes = [1, 4, 64], strides = [1, 1, 1]} : vector<4x4x64xf32> to vector<1x4x64xf32>
    %275 = vector.shape_cast %274 : vector<1x4x64xf32> to vector<4x64xf32>
    %276 = vector.shape_cast %275 : vector<4x64xf32> to vector<1x4x64xf32>
    %277 = vector.broadcast %273 : vector<2x1x64xf32> to vector<2x4x64xf32>
    %278 = vector.broadcast %276 : vector<1x4x64xf32> to vector<2x4x64xf32>
    %279 = arith.mulf %277, %278 : vector<2x4x64xf32>
    %280 = arith.subf %266, %279 : vector<2x4x64xf32>
    %281 = vector.extract_strided_slice %268 {offsets = [0, 1, 0], sizes = [2, 1, 64], strides = [1, 1, 1]} : vector<2x4x64xf32> to vector<2x1x64xf32>
    %282 = vector.shape_cast %281 : vector<2x1x64xf32> to vector<2x64xf32>
    %283 = vector.shape_cast %282 : vector<2x64xf32> to vector<2x1x64xf32>
    %284 = vector.extract_strided_slice %270 {offsets = [1, 0, 0], sizes = [1, 4, 64], strides = [1, 1, 1]} : vector<4x4x64xf32> to vector<1x4x64xf32>
    %285 = vector.shape_cast %284 : vector<1x4x64xf32> to vector<4x64xf32>
    %286 = vector.shape_cast %285 : vector<4x64xf32> to vector<1x4x64xf32>
    %287 = vector.broadcast %283 : vector<2x1x64xf32> to vector<2x4x64xf32>
    %288 = vector.broadcast %286 : vector<1x4x64xf32> to vector<2x4x64xf32>
    %289 = arith.mulf %287, %288 : vector<2x4x64xf32>
    %290 = arith.subf %280, %289 : vector<2x4x64xf32>
    %291 = vector.extract_strided_slice %268 {offsets = [0, 2, 0], sizes = [2, 1, 64], strides = [1, 1, 1]} : vector<2x4x64xf32> to vector<2x1x64xf32>
    %292 = vector.shape_cast %291 : vector<2x1x64xf32> to vector<2x64xf32>
    %293 = vector.shape_cast %292 : vector<2x64xf32> to vector<2x1x64xf32>
    %294 = vector.extract_strided_slice %270 {offsets = [2, 0, 0], sizes = [1, 4, 64], strides = [1, 1, 1]} : vector<4x4x64xf32> to vector<1x4x64xf32>
    %295 = vector.shape_cast %294 : vector<1x4x64xf32> to vector<4x64xf32>
    %296 = vector.shape_cast %295 : vector<4x64xf32> to vector<1x4x64xf32>
    %297 = vector.broadcast %293 : vector<2x1x64xf32> to vector<2x4x64xf32>
    %298 = vector.broadcast %296 : vector<1x4x64xf32> to vector<2x4x64xf32>
    %299 = arith.mulf %297, %298 : vector<2x4x64xf32>
    %300 = arith.subf %290, %299 : vector<2x4x64xf32>
    %301 = vector.extract_strided_slice %268 {offsets = [0, 3, 0], sizes = [2, 1, 64], strides = [1, 1, 1]} : vector<2x4x64xf32> to vector<2x1x64xf32>
    %302 = vector.shape_cast %301 : vector<2x1x64xf32> to vector<2x64xf32>
    %303 = vector.shape_cast %302 : vector<2x64xf32> to vector<2x1x64xf32>
    %304 = vector.extract_strided_slice %270 {offsets = [3, 0, 0], sizes = [1, 4, 64], strides = [1, 1, 1]} : vector<4x4x64xf32> to vector<1x4x64xf32>
    %305 = vector.shape_cast %304 : vector<1x4x64xf32> to vector<4x64xf32>
    %306 = vector.shape_cast %305 : vector<4x64xf32> to vector<1x4x64xf32>
    %307 = vector.broadcast %303 : vector<2x1x64xf32> to vector<2x4x64xf32>
    %308 = vector.broadcast %306 : vector<1x4x64xf32> to vector<2x4x64xf32>
    %309 = arith.mulf %307, %308 : vector<2x4x64xf32>
    %310 = arith.subf %300, %309 : vector<2x4x64xf32>
    %311 = vector.extract_strided_slice %0 {offsets = [3, 0, 0, 0], sizes = [1, 2, 4, 64], strides = [1, 1, 1, 1]} : vector<4x2x4x64xf32> to vector<1x2x4x64xf32>
    %312 = vector.shape_cast %311 : vector<1x2x4x64xf32> to vector<2x4x64xf32>
    %313 = vector.extract_strided_slice %1 {offsets = [2, 0, 0, 0], sizes = [1, 4, 4, 64], strides = [1, 1, 1, 1]} : vector<4x4x4x64xf32> to vector<1x4x4x64xf32>
    %314 = vector.shape_cast %313 : vector<1x4x4x64xf32> to vector<4x4x64xf32>
    %315 = vector.extract_strided_slice %312 {offsets = [0, 0, 0], sizes = [2, 1, 64], strides = [1, 1, 1]} : vector<2x4x64xf32> to vector<2x1x64xf32>
    %316 = vector.shape_cast %315 : vector<2x1x64xf32> to vector<2x64xf32>
    %317 = vector.shape_cast %316 : vector<2x64xf32> to vector<2x1x64xf32>
    %318 = vector.extract_strided_slice %314 {offsets = [0, 0, 0], sizes = [1, 4, 64], strides = [1, 1, 1]} : vector<4x4x64xf32> to vector<1x4x64xf32>
    %319 = vector.shape_cast %318 : vector<1x4x64xf32> to vector<4x64xf32>
    %320 = vector.shape_cast %319 : vector<4x64xf32> to vector<1x4x64xf32>
    %321 = vector.broadcast %317 : vector<2x1x64xf32> to vector<2x4x64xf32>
    %322 = vector.broadcast %320 : vector<1x4x64xf32> to vector<2x4x64xf32>
    %323 = arith.mulf %321, %322 : vector<2x4x64xf32>
    %324 = arith.addf %310, %323 : vector<2x4x64xf32>
    %325 = vector.extract_strided_slice %312 {offsets = [0, 1, 0], sizes = [2, 1, 64], strides = [1, 1, 1]} : vector<2x4x64xf32> to vector<2x1x64xf32>
    %326 = vector.shape_cast %325 : vector<2x1x64xf32> to vector<2x64xf32>
    %327 = vector.shape_cast %326 : vector<2x64xf32> to vector<2x1x64xf32>
    %328 = vector.extract_strided_slice %314 {offsets = [1, 0, 0], sizes = [1, 4, 64], strides = [1, 1, 1]} : vector<4x4x64xf32> to vector<1x4x64xf32>
    %329 = vector.shape_cast %328 : vector<1x4x64xf32> to vector<4x64xf32>
    %330 = vector.shape_cast %329 : vector<4x64xf32> to vector<1x4x64xf32>
    %331 = vector.broadcast %327 : vector<2x1x64xf32> to vector<2x4x64xf32>
    %332 = vector.broadcast %330 : vector<1x4x64xf32> to vector<2x4x64xf32>
    %333 = arith.mulf %331, %332 : vector<2x4x64xf32>
    %334 = arith.addf %324, %333 : vector<2x4x64xf32>
    %335 = vector.extract_strided_slice %312 {offsets = [0, 2, 0], sizes = [2, 1, 64], strides = [1, 1, 1]} : vector<2x4x64xf32> to vector<2x1x64xf32>
    %336 = vector.shape_cast %335 : vector<2x1x64xf32> to vector<2x64xf32>
    %337 = vector.shape_cast %336 : vector<2x64xf32> to vector<2x1x64xf32>
    %338 = vector.extract_strided_slice %314 {offsets = [2, 0, 0], sizes = [1, 4, 64], strides = [1, 1, 1]} : vector<4x4x64xf32> to vector<1x4x64xf32>
    %339 = vector.shape_cast %338 : vector<1x4x64xf32> to vector<4x64xf32>
    %340 = vector.shape_cast %339 : vector<4x64xf32> to vector<1x4x64xf32>
    %341 = vector.broadcast %337 : vector<2x1x64xf32> to vector<2x4x64xf32>
    %342 = vector.broadcast %340 : vector<1x4x64xf32> to vector<2x4x64xf32>
    %343 = arith.mulf %341, %342 : vector<2x4x64xf32>
    %344 = arith.addf %334, %343 : vector<2x4x64xf32>
    %345 = vector.extract_strided_slice %312 {offsets = [0, 3, 0], sizes = [2, 1, 64], strides = [1, 1, 1]} : vector<2x4x64xf32> to vector<2x1x64xf32>
    %346 = vector.shape_cast %345 : vector<2x1x64xf32> to vector<2x64xf32>
    %347 = vector.shape_cast %346 : vector<2x64xf32> to vector<2x1x64xf32>
    %348 = vector.extract_strided_slice %314 {offsets = [3, 0, 0], sizes = [1, 4, 64], strides = [1, 1, 1]} : vector<4x4x64xf32> to vector<1x4x64xf32>
    %349 = vector.shape_cast %348 : vector<1x4x64xf32> to vector<4x64xf32>
    %350 = vector.shape_cast %349 : vector<4x64xf32> to vector<1x4x64xf32>
    %351 = vector.broadcast %347 : vector<2x1x64xf32> to vector<2x4x64xf32>
    %352 = vector.broadcast %350 : vector<1x4x64xf32> to vector<2x4x64xf32>
    %353 = arith.mulf %351, %352 : vector<2x4x64xf32>
    %354 = arith.addf %344, %353 : vector<2x4x64xf32>
    %c1 = arith.constant 1 : index
    %c0_11 = arith.constant 0 : index
    %c0_12 = arith.constant 0 : index
    %c0_13 = arith.constant 0 : index
    %355 = vector.load %arg3[%c1, %c0_11, %c0_12, %c0_13] : memref<4x2x4x64xf32, #tpu.memory_space<vmem>>, vector<1x2x4x64xf32>
    %356 = vector.shape_cast %355 : vector<1x2x4x64xf32> to vector<2x4x64xf32>
    %357 = vector.shape_cast %354 : vector<2x4x64xf32> to vector<1x2x4x64xf32>
    tpu.vector_store %arg3[%c1, %c0_11, %c0_12, %c0_13], %357 {strides = array<i32>} : memref<4x2x4x64xf32, #tpu.memory_space<vmem>>, vector<1x2x4x64xf32>,
    %358 = vector.extract_strided_slice %0 {offsets = [0, 0, 0, 0], sizes = [1, 2, 4, 64], strides = [1, 1, 1, 1]} : vector<4x2x4x64xf32> to vector<1x2x4x64xf32>
    %359 = vector.shape_cast %358 : vector<1x2x4x64xf32> to vector<2x4x64xf32>
    %360 = vector.extract_strided_slice %1 {offsets = [2, 0, 0, 0], sizes = [1, 4, 4, 64], strides = [1, 1, 1, 1]} : vector<4x4x4x64xf32> to vector<1x4x4x64xf32>
    %361 = vector.shape_cast %360 : vector<1x4x4x64xf32> to vector<4x4x64xf32>
    %362 = vector.extract_strided_slice %359 {offsets = [0, 0, 0], sizes = [2, 1, 64], strides = [1, 1, 1]} : vector<2x4x64xf32> to vector<2x1x64xf32>
    %363 = vector.shape_cast %362 : vector<2x1x64xf32> to vector<2x64xf32>
    %364 = vector.shape_cast %363 : vector<2x64xf32> to vector<2x1x64xf32>
    %365 = vector.extract_strided_slice %361 {offsets = [0, 0, 0], sizes = [1, 4, 64], strides = [1, 1, 1]} : vector<4x4x64xf32> to vector<1x4x64xf32>
    %366 = vector.shape_cast %365 : vector<1x4x64xf32> to vector<4x64xf32>
    %367 = vector.shape_cast %366 : vector<4x64xf32> to vector<1x4x64xf32>
    %368 = vector.broadcast %364 : vector<2x1x64xf32> to vector<2x4x64xf32>
    %369 = vector.broadcast %367 : vector<1x4x64xf32> to vector<2x4x64xf32>
    %370 = arith.mulf %368, %369 : vector<2x4x64xf32>
    %371 = vector.extract_strided_slice %359 {offsets = [0, 1, 0], sizes = [2, 1, 64], strides = [1, 1, 1]} : vector<2x4x64xf32> to vector<2x1x64xf32>
    %372 = vector.shape_cast %371 : vector<2x1x64xf32> to vector<2x64xf32>
    %373 = vector.shape_cast %372 : vector<2x64xf32> to vector<2x1x64xf32>
    %374 = vector.extract_strided_slice %361 {offsets = [1, 0, 0], sizes = [1, 4, 64], strides = [1, 1, 1]} : vector<4x4x64xf32> to vector<1x4x64xf32>
    %375 = vector.shape_cast %374 : vector<1x4x64xf32> to vector<4x64xf32>
    %376 = vector.shape_cast %375 : vector<4x64xf32> to vector<1x4x64xf32>
    %377 = vector.broadcast %373 : vector<2x1x64xf32> to vector<2x4x64xf32>
    %378 = vector.broadcast %376 : vector<1x4x64xf32> to vector<2x4x64xf32>
    %379 = arith.mulf %377, %378 : vector<2x4x64xf32>
    %380 = arith.addf %370, %379 : vector<2x4x64xf32>
    %381 = vector.extract_strided_slice %359 {offsets = [0, 2, 0], sizes = [2, 1, 64], strides = [1, 1, 1]} : vector<2x4x64xf32> to vector<2x1x64xf32>
    %382 = vector.shape_cast %381 : vector<2x1x64xf32> to vector<2x64xf32>
    %383 = vector.shape_cast %382 : vector<2x64xf32> to vector<2x1x64xf32>
    %384 = vector.extract_strided_slice %361 {offsets = [2, 0, 0], sizes = [1, 4, 64], strides = [1, 1, 1]} : vector<4x4x64xf32> to vector<1x4x64xf32>
    %385 = vector.shape_cast %384 : vector<1x4x64xf32> to vector<4x64xf32>
    %386 = vector.shape_cast %385 : vector<4x64xf32> to vector<1x4x64xf32>
    %387 = vector.broadcast %383 : vector<2x1x64xf32> to vector<2x4x64xf32>
    %388 = vector.broadcast %386 : vector<1x4x64xf32> to vector<2x4x64xf32>
    %389 = arith.mulf %387, %388 : vector<2x4x64xf32>
    %390 = arith.addf %380, %389 : vector<2x4x64xf32>
    %391 = vector.extract_strided_slice %359 {offsets = [0, 3, 0], sizes = [2, 1, 64], strides = [1, 1, 1]} : vector<2x4x64xf32> to vector<2x1x64xf32>
    %392 = vector.shape_cast %391 : vector<2x1x64xf32> to vector<2x64xf32>
    %393 = vector.shape_cast %392 : vector<2x64xf32> to vector<2x1x64xf32>
    %394 = vector.extract_strided_slice %361 {offsets = [3, 0, 0], sizes = [1, 4, 64], strides = [1, 1, 1]} : vector<4x4x64xf32> to vector<1x4x64xf32>
    %395 = vector.shape_cast %394 : vector<1x4x64xf32> to vector<4x64xf32>
    %396 = vector.shape_cast %395 : vector<4x64xf32> to vector<1x4x64xf32>
    %397 = vector.broadcast %393 : vector<2x1x64xf32> to vector<2x4x64xf32>
    %398 = vector.broadcast %396 : vector<1x4x64xf32> to vector<2x4x64xf32>
    %399 = arith.mulf %397, %398 : vector<2x4x64xf32>
    %400 = arith.addf %390, %399 : vector<2x4x64xf32>
    %401 = vector.extract_strided_slice %0 {offsets = [1, 0, 0, 0], sizes = [1, 2, 4, 64], strides = [1, 1, 1, 1]} : vector<4x2x4x64xf32> to vector<1x2x4x64xf32>
    %402 = vector.shape_cast %401 : vector<1x2x4x64xf32> to vector<2x4x64xf32>
    %403 = vector.extract_strided_slice %1 {offsets = [3, 0, 0, 0], sizes = [1, 4, 4, 64], strides = [1, 1, 1, 1]} : vector<4x4x4x64xf32> to vector<1x4x4x64xf32>
    %404 = vector.shape_cast %403 : vector<1x4x4x64xf32> to vector<4x4x64xf32>
    %405 = vector.extract_strided_slice %402 {offsets = [0, 0, 0], sizes = [2, 1, 64], strides = [1, 1, 1]} : vector<2x4x64xf32> to vector<2x1x64xf32>
    %406 = vector.shape_cast %405 : vector<2x1x64xf32> to vector<2x64xf32>
    %407 = vector.shape_cast %406 : vector<2x64xf32> to vector<2x1x64xf32>
    %408 = vector.extract_strided_slice %404 {offsets = [0, 0, 0], sizes = [1, 4, 64], strides = [1, 1, 1]} : vector<4x4x64xf32> to vector<1x4x64xf32>
    %409 = vector.shape_cast %408 : vector<1x4x64xf32> to vector<4x64xf32>
    %410 = vector.shape_cast %409 : vector<4x64xf32> to vector<1x4x64xf32>
    %411 = vector.broadcast %407 : vector<2x1x64xf32> to vector<2x4x64xf32>
    %412 = vector.broadcast %410 : vector<1x4x64xf32> to vector<2x4x64xf32>
    %413 = arith.mulf %411, %412 : vector<2x4x64xf32>
    %414 = arith.addf %400, %413 : vector<2x4x64xf32>
    %415 = vector.extract_strided_slice %402 {offsets = [0, 1, 0], sizes = [2, 1, 64], strides = [1, 1, 1]} : vector<2x4x64xf32> to vector<2x1x64xf32>
    %416 = vector.shape_cast %415 : vector<2x1x64xf32> to vector<2x64xf32>
    %417 = vector.shape_cast %416 : vector<2x64xf32> to vector<2x1x64xf32>
    %418 = vector.extract_strided_slice %404 {offsets = [1, 0, 0], sizes = [1, 4, 64], strides = [1, 1, 1]} : vector<4x4x64xf32> to vector<1x4x64xf32>
    %419 = vector.shape_cast %418 : vector<1x4x64xf32> to vector<4x64xf32>
    %420 = vector.shape_cast %419 : vector<4x64xf32> to vector<1x4x64xf32>
    %421 = vector.broadcast %417 : vector<2x1x64xf32> to vector<2x4x64xf32>
    %422 = vector.broadcast %420 : vector<1x4x64xf32> to vector<2x4x64xf32>
    %423 = arith.mulf %421, %422 : vector<2x4x64xf32>
    %424 = arith.addf %414, %423 : vector<2x4x64xf32>
    %425 = vector.extract_strided_slice %402 {offsets = [0, 2, 0], sizes = [2, 1, 64], strides = [1, 1, 1]} : vector<2x4x64xf32> to vector<2x1x64xf32>
    %426 = vector.shape_cast %425 : vector<2x1x64xf32> to vector<2x64xf32>
    %427 = vector.shape_cast %426 : vector<2x64xf32> to vector<2x1x64xf32>
    %428 = vector.extract_strided_slice %404 {offsets = [2, 0, 0], sizes = [1, 4, 64], strides = [1, 1, 1]} : vector<4x4x64xf32> to vector<1x4x64xf32>
    %429 = vector.shape_cast %428 : vector<1x4x64xf32> to vector<4x64xf32>
    %430 = vector.shape_cast %429 : vector<4x64xf32> to vector<1x4x64xf32>
    %431 = vector.broadcast %427 : vector<2x1x64xf32> to vector<2x4x64xf32>
    %432 = vector.broadcast %430 : vector<1x4x64xf32> to vector<2x4x64xf32>
    %433 = arith.mulf %431, %432 : vector<2x4x64xf32>
    %434 = arith.addf %424, %433 : vector<2x4x64xf32>
    %435 = vector.extract_strided_slice %402 {offsets = [0, 3, 0], sizes = [2, 1, 64], strides = [1, 1, 1]} : vector<2x4x64xf32> to vector<2x1x64xf32>
    %436 = vector.shape_cast %435 : vector<2x1x64xf32> to vector<2x64xf32>
    %437 = vector.shape_cast %436 : vector<2x64xf32> to vector<2x1x64xf32>
    %438 = vector.extract_strided_slice %404 {offsets = [3, 0, 0], sizes = [1, 4, 64], strides = [1, 1, 1]} : vector<4x4x64xf32> to vector<1x4x64xf32>
    %439 = vector.shape_cast %438 : vector<1x4x64xf32> to vector<4x64xf32>
    %440 = vector.shape_cast %439 : vector<4x64xf32> to vector<1x4x64xf32>
    %441 = vector.broadcast %437 : vector<2x1x64xf32> to vector<2x4x64xf32>
    %442 = vector.broadcast %440 : vector<1x4x64xf32> to vector<2x4x64xf32>
    %443 = arith.mulf %441, %442 : vector<2x4x64xf32>
    %444 = arith.addf %434, %443 : vector<2x4x64xf32>
    %445 = vector.extract_strided_slice %0 {offsets = [2, 0, 0, 0], sizes = [1, 2, 4, 64], strides = [1, 1, 1, 1]} : vector<4x2x4x64xf32> to vector<1x2x4x64xf32>
    %446 = vector.shape_cast %445 : vector<1x2x4x64xf32> to vector<2x4x64xf32>
    %447 = vector.extract_strided_slice %1 {offsets = [0, 0, 0, 0], sizes = [1, 4, 4, 64], strides = [1, 1, 1, 1]} : vector<4x4x4x64xf32> to vector<1x4x4x64xf32>
    %448 = vector.shape_cast %447 : vector<1x4x4x64xf32> to vector<4x4x64xf32>
    %449 = vector.extract_strided_slice %446 {offsets = [0, 0, 0], sizes = [2, 1, 64], strides = [1, 1, 1]} : vector<2x4x64xf32> to vector<2x1x64xf32>
    %450 = vector.shape_cast %449 : vector<2x1x64xf32> to vector<2x64xf32>
    %451 = vector.shape_cast %450 : vector<2x64xf32> to vector<2x1x64xf32>
    %452 = vector.extract_strided_slice %448 {offsets = [0, 0, 0], sizes = [1, 4, 64], strides = [1, 1, 1]} : vector<4x4x64xf32> to vector<1x4x64xf32>
    %453 = vector.shape_cast %452 : vector<1x4x64xf32> to vector<4x64xf32>
    %454 = vector.shape_cast %453 : vector<4x64xf32> to vector<1x4x64xf32>
    %455 = vector.broadcast %451 : vector<2x1x64xf32> to vector<2x4x64xf32>
    %456 = vector.broadcast %454 : vector<1x4x64xf32> to vector<2x4x64xf32>
    %457 = arith.mulf %455, %456 : vector<2x4x64xf32>
    %458 = arith.addf %444, %457 : vector<2x4x64xf32>
    %459 = vector.extract_strided_slice %446 {offsets = [0, 1, 0], sizes = [2, 1, 64], strides = [1, 1, 1]} : vector<2x4x64xf32> to vector<2x1x64xf32>
    %460 = vector.shape_cast %459 : vector<2x1x64xf32> to vector<2x64xf32>
    %461 = vector.shape_cast %460 : vector<2x64xf32> to vector<2x1x64xf32>
    %462 = vector.extract_strided_slice %448 {offsets = [1, 0, 0], sizes = [1, 4, 64], strides = [1, 1, 1]} : vector<4x4x64xf32> to vector<1x4x64xf32>
    %463 = vector.shape_cast %462 : vector<1x4x64xf32> to vector<4x64xf32>
    %464 = vector.shape_cast %463 : vector<4x64xf32> to vector<1x4x64xf32>
    %465 = vector.broadcast %461 : vector<2x1x64xf32> to vector<2x4x64xf32>
    %466 = vector.broadcast %464 : vector<1x4x64xf32> to vector<2x4x64xf32>
    %467 = arith.mulf %465, %466 : vector<2x4x64xf32>
    %468 = arith.addf %458, %467 : vector<2x4x64xf32>
    %469 = vector.extract_strided_slice %446 {offsets = [0, 2, 0], sizes = [2, 1, 64], strides = [1, 1, 1]} : vector<2x4x64xf32> to vector<2x1x64xf32>
    %470 = vector.shape_cast %469 : vector<2x1x64xf32> to vector<2x64xf32>
    %471 = vector.shape_cast %470 : vector<2x64xf32> to vector<2x1x64xf32>
    %472 = vector.extract_strided_slice %448 {offsets = [2, 0, 0], sizes = [1, 4, 64], strides = [1, 1, 1]} : vector<4x4x64xf32> to vector<1x4x64xf32>
    %473 = vector.shape_cast %472 : vector<1x4x64xf32> to vector<4x64xf32>
    %474 = vector.shape_cast %473 : vector<4x64xf32> to vector<1x4x64xf32>
    %475 = vector.broadcast %471 : vector<2x1x64xf32> to vector<2x4x64xf32>
    %476 = vector.broadcast %474 : vector<1x4x64xf32> to vector<2x4x64xf32>
    %477 = arith.mulf %475, %476 : vector<2x4x64xf32>
    %478 = arith.addf %468, %477 : vector<2x4x64xf32>
    %479 = vector.extract_strided_slice %446 {offsets = [0, 3, 0], sizes = [2, 1, 64], strides = [1, 1, 1]} : vector<2x4x64xf32> to vector<2x1x64xf32>
    %480 = vector.shape_cast %479 : vector<2x1x64xf32> to vector<2x64xf32>
    %481 = vector.shape_cast %480 : vector<2x64xf32> to vector<2x1x64xf32>
    %482 = vector.extract_strided_slice %448 {offsets = [3, 0, 0], sizes = [1, 4, 64], strides = [1, 1, 1]} : vector<4x4x64xf32> to vector<1x4x64xf32>
    %483 = vector.shape_cast %482 : vector<1x4x64xf32> to vector<4x64xf32>
    %484 = vector.shape_cast %483 : vector<4x64xf32> to vector<1x4x64xf32>
    %485 = vector.broadcast %481 : vector<2x1x64xf32> to vector<2x4x64xf32>
    %486 = vector.broadcast %484 : vector<1x4x64xf32> to vector<2x4x64xf32>
    %487 = arith.mulf %485, %486 : vector<2x4x64xf32>
    %488 = arith.addf %478, %487 : vector<2x4x64xf32>
    %489 = vector.extract_strided_slice %0 {offsets = [3, 0, 0, 0], sizes = [1, 2, 4, 64], strides = [1, 1, 1, 1]} : vector<4x2x4x64xf32> to vector<1x2x4x64xf32>
    %490 = vector.shape_cast %489 : vector<1x2x4x64xf32> to vector<2x4x64xf32>
    %491 = vector.extract_strided_slice %1 {offsets = [1, 0, 0, 0], sizes = [1, 4, 4, 64], strides = [1, 1, 1, 1]} : vector<4x4x4x64xf32> to vector<1x4x4x64xf32>
    %492 = vector.shape_cast %491 : vector<1x4x4x64xf32> to vector<4x4x64xf32>
    %493 = vector.extract_strided_slice %490 {offsets = [0, 0, 0], sizes = [2, 1, 64], strides = [1, 1, 1]} : vector<2x4x64xf32> to vector<2x1x64xf32>
    %494 = vector.shape_cast %493 : vector<2x1x64xf32> to vector<2x64xf32>
    %495 = vector.shape_cast %494 : vector<2x64xf32> to vector<2x1x64xf32>
    %496 = vector.extract_strided_slice %492 {offsets = [0, 0, 0], sizes = [1, 4, 64], strides = [1, 1, 1]} : vector<4x4x64xf32> to vector<1x4x64xf32>
    %497 = vector.shape_cast %496 : vector<1x4x64xf32> to vector<4x64xf32>
    %498 = vector.shape_cast %497 : vector<4x64xf32> to vector<1x4x64xf32>
    %499 = vector.broadcast %495 : vector<2x1x64xf32> to vector<2x4x64xf32>
    %500 = vector.broadcast %498 : vector<1x4x64xf32> to vector<2x4x64xf32>
    %501 = arith.mulf %499, %500 : vector<2x4x64xf32>
    %502 = arith.subf %488, %501 : vector<2x4x64xf32>
    %503 = vector.extract_strided_slice %490 {offsets = [0, 1, 0], sizes = [2, 1, 64], strides = [1, 1, 1]} : vector<2x4x64xf32> to vector<2x1x64xf32>
    %504 = vector.shape_cast %503 : vector<2x1x64xf32> to vector<2x64xf32>
    %505 = vector.shape_cast %504 : vector<2x64xf32> to vector<2x1x64xf32>
    %506 = vector.extract_strided_slice %492 {offsets = [1, 0, 0], sizes = [1, 4, 64], strides = [1, 1, 1]} : vector<4x4x64xf32> to vector<1x4x64xf32>
    %507 = vector.shape_cast %506 : vector<1x4x64xf32> to vector<4x64xf32>
    %508 = vector.shape_cast %507 : vector<4x64xf32> to vector<1x4x64xf32>
    %509 = vector.broadcast %505 : vector<2x1x64xf32> to vector<2x4x64xf32>
    %510 = vector.broadcast %508 : vector<1x4x64xf32> to vector<2x4x64xf32>
    %511 = arith.mulf %509, %510 : vector<2x4x64xf32>
    %512 = arith.subf %502, %511 : vector<2x4x64xf32>
    %513 = vector.extract_strided_slice %490 {offsets = [0, 2, 0], sizes = [2, 1, 64], strides = [1, 1, 1]} : vector<2x4x64xf32> to vector<2x1x64xf32>
    %514 = vector.shape_cast %513 : vector<2x1x64xf32> to vector<2x64xf32>
    %515 = vector.shape_cast %514 : vector<2x64xf32> to vector<2x1x64xf32>
    %516 = vector.extract_strided_slice %492 {offsets = [2, 0, 0], sizes = [1, 4, 64], strides = [1, 1, 1]} : vector<4x4x64xf32> to vector<1x4x64xf32>
    %517 = vector.shape_cast %516 : vector<1x4x64xf32> to vector<4x64xf32>
    %518 = vector.shape_cast %517 : vector<4x64xf32> to vector<1x4x64xf32>
    %519 = vector.broadcast %515 : vector<2x1x64xf32> to vector<2x4x64xf32>
    %520 = vector.broadcast %518 : vector<1x4x64xf32> to vector<2x4x64xf32>
    %521 = arith.mulf %519, %520 : vector<2x4x64xf32>
    %522 = arith.subf %512, %521 : vector<2x4x64xf32>
    %523 = vector.extract_strided_slice %490 {offsets = [0, 3, 0], sizes = [2, 1, 64], strides = [1, 1, 1]} : vector<2x4x64xf32> to vector<2x1x64xf32>
    %524 = vector.shape_cast %523 : vector<2x1x64xf32> to vector<2x64xf32>
    %525 = vector.shape_cast %524 : vector<2x64xf32> to vector<2x1x64xf32>
    %526 = vector.extract_strided_slice %492 {offsets = [3, 0, 0], sizes = [1, 4, 64], strides = [1, 1, 1]} : vector<4x4x64xf32> to vector<1x4x64xf32>
    %527 = vector.shape_cast %526 : vector<1x4x64xf32> to vector<4x64xf32>
    %528 = vector.shape_cast %527 : vector<4x64xf32> to vector<1x4x64xf32>
    %529 = vector.broadcast %525 : vector<2x1x64xf32> to vector<2x4x64xf32>
    %530 = vector.broadcast %528 : vector<1x4x64xf32> to vector<2x4x64xf32>
    %531 = arith.mulf %529, %530 : vector<2x4x64xf32>
    %532 = arith.subf %522, %531 : vector<2x4x64xf32>
    %c2 = arith.constant 2 : index
    %c0_14 = arith.constant 0 : index
    %c0_15 = arith.constant 0 : index
    %c0_16 = arith.constant 0 : index
    %533 = vector.load %arg3[%c2, %c0_14, %c0_15, %c0_16] : memref<4x2x4x64xf32, #tpu.memory_space<vmem>>, vector<1x2x4x64xf32>
    %534 = vector.shape_cast %533 : vector<1x2x4x64xf32> to vector<2x4x64xf32>
    %535 = vector.shape_cast %532 : vector<2x4x64xf32> to vector<1x2x4x64xf32>
    tpu.vector_store %arg3[%c2, %c0_14, %c0_15, %c0_16], %535 {strides = array<i32>} : memref<4x2x4x64xf32, #tpu.memory_space<vmem>>, vector<1x2x4x64xf32>,
    %536 = vector.extract_strided_slice %0 {offsets = [0, 0, 0, 0], sizes = [1, 2, 4, 64], strides = [1, 1, 1, 1]} : vector<4x2x4x64xf32> to vector<1x2x4x64xf32>
    %537 = vector.shape_cast %536 : vector<1x2x4x64xf32> to vector<2x4x64xf32>
    %538 = vector.extract_strided_slice %1 {offsets = [3, 0, 0, 0], sizes = [1, 4, 4, 64], strides = [1, 1, 1, 1]} : vector<4x4x4x64xf32> to vector<1x4x4x64xf32>
    %539 = vector.shape_cast %538 : vector<1x4x4x64xf32> to vector<4x4x64xf32>
    %540 = vector.extract_strided_slice %537 {offsets = [0, 0, 0], sizes = [2, 1, 64], strides = [1, 1, 1]} : vector<2x4x64xf32> to vector<2x1x64xf32>
    %541 = vector.shape_cast %540 : vector<2x1x64xf32> to vector<2x64xf32>
    %542 = vector.shape_cast %541 : vector<2x64xf32> to vector<2x1x64xf32>
    %543 = vector.extract_strided_slice %539 {offsets = [0, 0, 0], sizes = [1, 4, 64], strides = [1, 1, 1]} : vector<4x4x64xf32> to vector<1x4x64xf32>
    %544 = vector.shape_cast %543 : vector<1x4x64xf32> to vector<4x64xf32>
    %545 = vector.shape_cast %544 : vector<4x64xf32> to vector<1x4x64xf32>
    %546 = vector.broadcast %542 : vector<2x1x64xf32> to vector<2x4x64xf32>
    %547 = vector.broadcast %545 : vector<1x4x64xf32> to vector<2x4x64xf32>
    %548 = arith.mulf %546, %547 : vector<2x4x64xf32>
    %549 = vector.extract_strided_slice %537 {offsets = [0, 1, 0], sizes = [2, 1, 64], strides = [1, 1, 1]} : vector<2x4x64xf32> to vector<2x1x64xf32>
    %550 = vector.shape_cast %549 : vector<2x1x64xf32> to vector<2x64xf32>
    %551 = vector.shape_cast %550 : vector<2x64xf32> to vector<2x1x64xf32>
    %552 = vector.extract_strided_slice %539 {offsets = [1, 0, 0], sizes = [1, 4, 64], strides = [1, 1, 1]} : vector<4x4x64xf32> to vector<1x4x64xf32>
    %553 = vector.shape_cast %552 : vector<1x4x64xf32> to vector<4x64xf32>
    %554 = vector.shape_cast %553 : vector<4x64xf32> to vector<1x4x64xf32>
    %555 = vector.broadcast %551 : vector<2x1x64xf32> to vector<2x4x64xf32>
    %556 = vector.broadcast %554 : vector<1x4x64xf32> to vector<2x4x64xf32>
    %557 = arith.mulf %555, %556 : vector<2x4x64xf32>
    %558 = arith.addf %548, %557 : vector<2x4x64xf32>
    %559 = vector.extract_strided_slice %537 {offsets = [0, 2, 0], sizes = [2, 1, 64], strides = [1, 1, 1]} : vector<2x4x64xf32> to vector<2x1x64xf32>
    %560 = vector.shape_cast %559 : vector<2x1x64xf32> to vector<2x64xf32>
    %561 = vector.shape_cast %560 : vector<2x64xf32> to vector<2x1x64xf32>
    %562 = vector.extract_strided_slice %539 {offsets = [2, 0, 0], sizes = [1, 4, 64], strides = [1, 1, 1]} : vector<4x4x64xf32> to vector<1x4x64xf32>
    %563 = vector.shape_cast %562 : vector<1x4x64xf32> to vector<4x64xf32>
    %564 = vector.shape_cast %563 : vector<4x64xf32> to vector<1x4x64xf32>
    %565 = vector.broadcast %561 : vector<2x1x64xf32> to vector<2x4x64xf32>
    %566 = vector.broadcast %564 : vector<1x4x64xf32> to vector<2x4x64xf32>
    %567 = arith.mulf %565, %566 : vector<2x4x64xf32>
    %568 = arith.addf %558, %567 : vector<2x4x64xf32>
    %569 = vector.extract_strided_slice %537 {offsets = [0, 3, 0], sizes = [2, 1, 64], strides = [1, 1, 1]} : vector<2x4x64xf32> to vector<2x1x64xf32>
    %570 = vector.shape_cast %569 : vector<2x1x64xf32> to vector<2x64xf32>
    %571 = vector.shape_cast %570 : vector<2x64xf32> to vector<2x1x64xf32>
    %572 = vector.extract_strided_slice %539 {offsets = [3, 0, 0], sizes = [1, 4, 64], strides = [1, 1, 1]} : vector<4x4x64xf32> to vector<1x4x64xf32>
    %573 = vector.shape_cast %572 : vector<1x4x64xf32> to vector<4x64xf32>
    %574 = vector.shape_cast %573 : vector<4x64xf32> to vector<1x4x64xf32>
    %575 = vector.broadcast %571 : vector<2x1x64xf32> to vector<2x4x64xf32>
    %576 = vector.broadcast %574 : vector<1x4x64xf32> to vector<2x4x64xf32>
    %577 = arith.mulf %575, %576 : vector<2x4x64xf32>
    %578 = arith.addf %568, %577 : vector<2x4x64xf32>
    %579 = vector.extract_strided_slice %0 {offsets = [1, 0, 0, 0], sizes = [1, 2, 4, 64], strides = [1, 1, 1, 1]} : vector<4x2x4x64xf32> to vector<1x2x4x64xf32>
    %580 = vector.shape_cast %579 : vector<1x2x4x64xf32> to vector<2x4x64xf32>
    %581 = vector.extract_strided_slice %1 {offsets = [2, 0, 0, 0], sizes = [1, 4, 4, 64], strides = [1, 1, 1, 1]} : vector<4x4x4x64xf32> to vector<1x4x4x64xf32>
    %582 = vector.shape_cast %581 : vector<1x4x4x64xf32> to vector<4x4x64xf32>
    %583 = vector.extract_strided_slice %580 {offsets = [0, 0, 0], sizes = [2, 1, 64], strides = [1, 1, 1]} : vector<2x4x64xf32> to vector<2x1x64xf32>
    %584 = vector.shape_cast %583 : vector<2x1x64xf32> to vector<2x64xf32>
    %585 = vector.shape_cast %584 : vector<2x64xf32> to vector<2x1x64xf32>
    %586 = vector.extract_strided_slice %582 {offsets = [0, 0, 0], sizes = [1, 4, 64], strides = [1, 1, 1]} : vector<4x4x64xf32> to vector<1x4x64xf32>
    %587 = vector.shape_cast %586 : vector<1x4x64xf32> to vector<4x64xf32>
    %588 = vector.shape_cast %587 : vector<4x64xf32> to vector<1x4x64xf32>
    %589 = vector.broadcast %585 : vector<2x1x64xf32> to vector<2x4x64xf32>
    %590 = vector.broadcast %588 : vector<1x4x64xf32> to vector<2x4x64xf32>
    %591 = arith.mulf %589, %590 : vector<2x4x64xf32>
    %592 = arith.addf %578, %591 : vector<2x4x64xf32>
    %593 = vector.extract_strided_slice %580 {offsets = [0, 1, 0], sizes = [2, 1, 64], strides = [1, 1, 1]} : vector<2x4x64xf32> to vector<2x1x64xf32>
    %594 = vector.shape_cast %593 : vector<2x1x64xf32> to vector<2x64xf32>
    %595 = vector.shape_cast %594 : vector<2x64xf32> to vector<2x1x64xf32>
    %596 = vector.extract_strided_slice %582 {offsets = [1, 0, 0], sizes = [1, 4, 64], strides = [1, 1, 1]} : vector<4x4x64xf32> to vector<1x4x64xf32>
    %597 = vector.shape_cast %596 : vector<1x4x64xf32> to vector<4x64xf32>
    %598 = vector.shape_cast %597 : vector<4x64xf32> to vector<1x4x64xf32>
    %599 = vector.broadcast %595 : vector<2x1x64xf32> to vector<2x4x64xf32>
    %600 = vector.broadcast %598 : vector<1x4x64xf32> to vector<2x4x64xf32>
    %601 = arith.mulf %599, %600 : vector<2x4x64xf32>
    %602 = arith.addf %592, %601 : vector<2x4x64xf32>
    %603 = vector.extract_strided_slice %580 {offsets = [0, 2, 0], sizes = [2, 1, 64], strides = [1, 1, 1]} : vector<2x4x64xf32> to vector<2x1x64xf32>
    %604 = vector.shape_cast %603 : vector<2x1x64xf32> to vector<2x64xf32>
    %605 = vector.shape_cast %604 : vector<2x64xf32> to vector<2x1x64xf32>
    %606 = vector.extract_strided_slice %582 {offsets = [2, 0, 0], sizes = [1, 4, 64], strides = [1, 1, 1]} : vector<4x4x64xf32> to vector<1x4x64xf32>
    %607 = vector.shape_cast %606 : vector<1x4x64xf32> to vector<4x64xf32>
    %608 = vector.shape_cast %607 : vector<4x64xf32> to vector<1x4x64xf32>
    %609 = vector.broadcast %605 : vector<2x1x64xf32> to vector<2x4x64xf32>
    %610 = vector.broadcast %608 : vector<1x4x64xf32> to vector<2x4x64xf32>
    %611 = arith.mulf %609, %610 : vector<2x4x64xf32>
    %612 = arith.addf %602, %611 : vector<2x4x64xf32>
    %613 = vector.extract_strided_slice %580 {offsets = [0, 3, 0], sizes = [2, 1, 64], strides = [1, 1, 1]} : vector<2x4x64xf32> to vector<2x1x64xf32>
    %614 = vector.shape_cast %613 : vector<2x1x64xf32> to vector<2x64xf32>
    %615 = vector.shape_cast %614 : vector<2x64xf32> to vector<2x1x64xf32>
    %616 = vector.extract_strided_slice %582 {offsets = [3, 0, 0], sizes = [1, 4, 64], strides = [1, 1, 1]} : vector<4x4x64xf32> to vector<1x4x64xf32>
    %617 = vector.shape_cast %616 : vector<1x4x64xf32> to vector<4x64xf32>
    %618 = vector.shape_cast %617 : vector<4x64xf32> to vector<1x4x64xf32>
    %619 = vector.broadcast %615 : vector<2x1x64xf32> to vector<2x4x64xf32>
    %620 = vector.broadcast %618 : vector<1x4x64xf32> to vector<2x4x64xf32>
    %621 = arith.mulf %619, %620 : vector<2x4x64xf32>
    %622 = arith.addf %612, %621 : vector<2x4x64xf32>
    %623 = vector.extract_strided_slice %0 {offsets = [2, 0, 0, 0], sizes = [1, 2, 4, 64], strides = [1, 1, 1, 1]} : vector<4x2x4x64xf32> to vector<1x2x4x64xf32>
    %624 = vector.shape_cast %623 : vector<1x2x4x64xf32> to vector<2x4x64xf32>
    %625 = vector.extract_strided_slice %1 {offsets = [1, 0, 0, 0], sizes = [1, 4, 4, 64], strides = [1, 1, 1, 1]} : vector<4x4x4x64xf32> to vector<1x4x4x64xf32>
    %626 = vector.shape_cast %625 : vector<1x4x4x64xf32> to vector<4x4x64xf32>
    %627 = vector.extract_strided_slice %624 {offsets = [0, 0, 0], sizes = [2, 1, 64], strides = [1, 1, 1]} : vector<2x4x64xf32> to vector<2x1x64xf32>
    %628 = vector.shape_cast %627 : vector<2x1x64xf32> to vector<2x64xf32>
    %629 = vector.shape_cast %628 : vector<2x64xf32> to vector<2x1x64xf32>
    %630 = vector.extract_strided_slice %626 {offsets = [0, 0, 0], sizes = [1, 4, 64], strides = [1, 1, 1]} : vector<4x4x64xf32> to vector<1x4x64xf32>
    %631 = vector.shape_cast %630 : vector<1x4x64xf32> to vector<4x64xf32>
    %632 = vector.shape_cast %631 : vector<4x64xf32> to vector<1x4x64xf32>
    %633 = vector.broadcast %629 : vector<2x1x64xf32> to vector<2x4x64xf32>
    %634 = vector.broadcast %632 : vector<1x4x64xf32> to vector<2x4x64xf32>
    %635 = arith.mulf %633, %634 : vector<2x4x64xf32>
    %636 = arith.subf %622, %635 : vector<2x4x64xf32>
    %637 = vector.extract_strided_slice %624 {offsets = [0, 1, 0], sizes = [2, 1, 64], strides = [1, 1, 1]} : vector<2x4x64xf32> to vector<2x1x64xf32>
    %638 = vector.shape_cast %637 : vector<2x1x64xf32> to vector<2x64xf32>
    %639 = vector.shape_cast %638 : vector<2x64xf32> to vector<2x1x64xf32>
    %640 = vector.extract_strided_slice %626 {offsets = [1, 0, 0], sizes = [1, 4, 64], strides = [1, 1, 1]} : vector<4x4x64xf32> to vector<1x4x64xf32>
    %641 = vector.shape_cast %640 : vector<1x4x64xf32> to vector<4x64xf32>
    %642 = vector.shape_cast %641 : vector<4x64xf32> to vector<1x4x64xf32>
    %643 = vector.broadcast %639 : vector<2x1x64xf32> to vector<2x4x64xf32>
    %644 = vector.broadcast %642 : vector<1x4x64xf32> to vector<2x4x64xf32>
    %645 = arith.mulf %643, %644 : vector<2x4x64xf32>
    %646 = arith.subf %636, %645 : vector<2x4x64xf32>
    %647 = vector.extract_strided_slice %624 {offsets = [0, 2, 0], sizes = [2, 1, 64], strides = [1, 1, 1]} : vector<2x4x64xf32> to vector<2x1x64xf32>
    %648 = vector.shape_cast %647 : vector<2x1x64xf32> to vector<2x64xf32>
    %649 = vector.shape_cast %648 : vector<2x64xf32> to vector<2x1x64xf32>
    %650 = vector.extract_strided_slice %626 {offsets = [2, 0, 0], sizes = [1, 4, 64], strides = [1, 1, 1]} : vector<4x4x64xf32> to vector<1x4x64xf32>
    %651 = vector.shape_cast %650 : vector<1x4x64xf32> to vector<4x64xf32>
    %652 = vector.shape_cast %651 : vector<4x64xf32> to vector<1x4x64xf32>
    %653 = vector.broadcast %649 : vector<2x1x64xf32> to vector<2x4x64xf32>
    %654 = vector.broadcast %652 : vector<1x4x64xf32> to vector<2x4x64xf32>
    %655 = arith.mulf %653, %654 : vector<2x4x64xf32>
    %656 = arith.subf %646, %655 : vector<2x4x64xf32>
    %657 = vector.extract_strided_slice %624 {offsets = [0, 3, 0], sizes = [2, 1, 64], strides = [1, 1, 1]} : vector<2x4x64xf32> to vector<2x1x64xf32>
    %658 = vector.shape_cast %657 : vector<2x1x64xf32> to vector<2x64xf32>
    %659 = vector.shape_cast %658 : vector<2x64xf32> to vector<2x1x64xf32>
    %660 = vector.extract_strided_slice %626 {offsets = [3, 0, 0], sizes = [1, 4, 64], strides = [1, 1, 1]} : vector<4x4x64xf32> to vector<1x4x64xf32>
    %661 = vector.shape_cast %660 : vector<1x4x64xf32> to vector<4x64xf32>
    %662 = vector.shape_cast %661 : vector<4x64xf32> to vector<1x4x64xf32>
    %663 = vector.broadcast %659 : vector<2x1x64xf32> to vector<2x4x64xf32>
    %664 = vector.broadcast %662 : vector<1x4x64xf32> to vector<2x4x64xf32>
    %665 = arith.mulf %663, %664 : vector<2x4x64xf32>
    %666 = arith.subf %656, %665 : vector<2x4x64xf32>
    %667 = vector.extract_strided_slice %0 {offsets = [3, 0, 0, 0], sizes = [1, 2, 4, 64], strides = [1, 1, 1, 1]} : vector<4x2x4x64xf32> to vector<1x2x4x64xf32>
    %668 = vector.shape_cast %667 : vector<1x2x4x64xf32> to vector<2x4x64xf32>
    %669 = vector.extract_strided_slice %1 {offsets = [0, 0, 0, 0], sizes = [1, 4, 4, 64], strides = [1, 1, 1, 1]} : vector<4x4x4x64xf32> to vector<1x4x4x64xf32>
    %670 = vector.shape_cast %669 : vector<1x4x4x64xf32> to vector<4x4x64xf32>
    %671 = vector.extract_strided_slice %668 {offsets = [0, 0, 0], sizes = [2, 1, 64], strides = [1, 1, 1]} : vector<2x4x64xf32> to vector<2x1x64xf32>
    %672 = vector.shape_cast %671 : vector<2x1x64xf32> to vector<2x64xf32>
    %673 = vector.shape_cast %672 : vector<2x64xf32> to vector<2x1x64xf32>
    %674 = vector.extract_strided_slice %670 {offsets = [0, 0, 0], sizes = [1, 4, 64], strides = [1, 1, 1]} : vector<4x4x64xf32> to vector<1x4x64xf32>
    %675 = vector.shape_cast %674 : vector<1x4x64xf32> to vector<4x64xf32>
    %676 = vector.shape_cast %675 : vector<4x64xf32> to vector<1x4x64xf32>
    %677 = vector.broadcast %673 : vector<2x1x64xf32> to vector<2x4x64xf32>
    %678 = vector.broadcast %676 : vector<1x4x64xf32> to vector<2x4x64xf32>
    %679 = arith.mulf %677, %678 : vector<2x4x64xf32>
    %680 = arith.addf %666, %679 : vector<2x4x64xf32>
    %681 = vector.extract_strided_slice %668 {offsets = [0, 1, 0], sizes = [2, 1, 64], strides = [1, 1, 1]} : vector<2x4x64xf32> to vector<2x1x64xf32>
    %682 = vector.shape_cast %681 : vector<2x1x64xf32> to vector<2x64xf32>
    %683 = vector.shape_cast %682 : vector<2x64xf32> to vector<2x1x64xf32>
    %684 = vector.extract_strided_slice %670 {offsets = [1, 0, 0], sizes = [1, 4, 64], strides = [1, 1, 1]} : vector<4x4x64xf32> to vector<1x4x64xf32>
    %685 = vector.shape_cast %684 : vector<1x4x64xf32> to vector<4x64xf32>
    %686 = vector.shape_cast %685 : vector<4x64xf32> to vector<1x4x64xf32>
    %687 = vector.broadcast %683 : vector<2x1x64xf32> to vector<2x4x64xf32>
    %688 = vector.broadcast %686 : vector<1x4x64xf32> to vector<2x4x64xf32>
    %689 = arith.mulf %687, %688 : vector<2x4x64xf32>
    %690 = arith.addf %680, %689 : vector<2x4x64xf32>
    %691 = vector.extract_strided_slice %668 {offsets = [0, 2, 0], sizes = [2, 1, 64], strides = [1, 1, 1]} : vector<2x4x64xf32> to vector<2x1x64xf32>
    %692 = vector.shape_cast %691 : vector<2x1x64xf32> to vector<2x64xf32>
    %693 = vector.shape_cast %692 : vector<2x64xf32> to vector<2x1x64xf32>
    %694 = vector.extract_strided_slice %670 {offsets = [2, 0, 0], sizes = [1, 4, 64], strides = [1, 1, 1]} : vector<4x4x64xf32> to vector<1x4x64xf32>
    %695 = vector.shape_cast %694 : vector<1x4x64xf32> to vector<4x64xf32>
    %696 = vector.shape_cast %695 : vector<4x64xf32> to vector<1x4x64xf32>
    %697 = vector.broadcast %693 : vector<2x1x64xf32> to vector<2x4x64xf32>
    %698 = vector.broadcast %696 : vector<1x4x64xf32> to vector<2x4x64xf32>
    %699 = arith.mulf %697, %698 : vector<2x4x64xf32>
    %700 = arith.addf %690, %699 : vector<2x4x64xf32>
    %701 = vector.extract_strided_slice %668 {offsets = [0, 3, 0], sizes = [2, 1, 64], strides = [1, 1, 1]} : vector<2x4x64xf32> to vector<2x1x64xf32>
    %702 = vector.shape_cast %701 : vector<2x1x64xf32> to vector<2x64xf32>
    %703 = vector.shape_cast %702 : vector<2x64xf32> to vector<2x1x64xf32>
    %704 = vector.extract_strided_slice %670 {offsets = [3, 0, 0], sizes = [1, 4, 64], strides = [1, 1, 1]} : vector<4x4x64xf32> to vector<1x4x64xf32>
    %705 = vector.shape_cast %704 : vector<1x4x64xf32> to vector<4x64xf32>
    %706 = vector.shape_cast %705 : vector<4x64xf32> to vector<1x4x64xf32>
    %707 = vector.broadcast %703 : vector<2x1x64xf32> to vector<2x4x64xf32>
    %708 = vector.broadcast %706 : vector<1x4x64xf32> to vector<2x4x64xf32>
    %709 = arith.mulf %707, %708 : vector<2x4x64xf32>
    %710 = arith.addf %700, %709 : vector<2x4x64xf32>
    %c3 = arith.constant 3 : index
    %c0_17 = arith.constant 0 : index
    %c0_18 = arith.constant 0 : index
    %c0_19 = arith.constant 0 : index
    %711 = vector.load %arg3[%c3, %c0_17, %c0_18, %c0_19] : memref<4x2x4x64xf32, #tpu.memory_space<vmem>>, vector<1x2x4x64xf32>
    %712 = vector.shape_cast %711 : vector<1x2x4x64xf32> to vector<2x4x64xf32>
    %713 = vector.shape_cast %710 : vector<2x4x64xf32> to vector<1x2x4x64xf32>
    tpu.vector_store %arg3[%c3, %c0_17, %c0_18, %c0_19], %713 {strides = array<i32>} : memref<4x2x4x64xf32, #tpu.memory_space<vmem>>, vector<1x2x4x64xf32>,
    return
  }
  func.func @transform_0(%arg0: i32) -> (i32, i32, i32, i32) {
    %c0_i32 = arith.constant 0 : i32
    %c0_i32_0 = arith.constant 0 : i32
    %c0_i32_1 = arith.constant 0 : i32
    %c0_i32_2 = arith.constant 0 : i32
    return %c0_i32, %c0_i32_0, %c0_i32_1, %arg0 : i32, i32, i32, i32
  }
  func.func @transform_1(%arg0: i32) -> (i32, i32, i32, i32) {
    %c0_i32 = arith.constant 0 : i32
    %c0_i32_0 = arith.constant 0 : i32
    %c0_i32_1 = arith.constant 0 : i32
    %c0_i32_2 = arith.constant 0 : i32
    return %c0_i32, %c0_i32_0, %c0_i32_1, %arg0 : i32, i32, i32, i32
  }
  func.func @transform_2(%arg0: i32) -> (i32, i32, i32, i32) {
    %c0_i32 = arith.constant 0 : i32
    %c0_i32_0 = arith.constant 0 : i32
    %c0_i32_1 = arith.constant 0 : i32
    %c0_i32_2 = arith.constant 0 : i32
    return %c0_i32, %c0_i32_0, %c0_i32_1, %arg0 : i32, i32, i32, i32
  }
}

</mosaic_0001>

<bundles_post_ra>
// kernel: squeeze.6
= control target key start
LH: loop header
LB: loop body
LE: loop exit
PB: predicated region body
PF: predicated region fallthrough
CT: control target
= control target key end

     0   :  { %vm12_vm0 = vcmask 64512   ;;  %s99_s12 = smov 104   ;;  %s100_s15 = smov 112   ;;  %s185_s0 = inlined_call_operand.vmem [shape: f32[1,2,4,64], index: 0, kind: input, shape index: {}]   ;;  %s186_s1 = inlined_call_operand.vmem [shape: f32[2,4,8,8], index: 1, kind: output, shape index: {}]  }
   0x1   :  { %v75_v0 = vld [vmem:[%s185_s0 + $0x4] sm:$0xf]  ;;  %v9_v1 = vld [vmem:[%s185_s0] sm:$0xf]  ;;  %s98_s0 = smov 120   ;;  %s101_s16 = smov 96  }
   0x2   :  { %8 = vst [vmem:[#allocation0 + $0x8] sm:$0xf] %v75_v0  ;;  %10 = vst [vmem:[#allocation0] sm:$0xf] %v9_v1  ;;  %s102_s17 = smov 88   ;;  %s103_s18 = smov 80  }
   0x3   :  { %s104_s19 = smov 72  }
   0x9   :  { %v19_v2 = vld.sshfl [vmem:[#allocation0] sm:$0xff pattern:$0xba983210]  }
   0xa   :  { %v11_v3 = vld [vmem:[#allocation0] sm:$0xf]   ;;  %20 = vrot.lane.b32.xlu0 %v19_v2, %s98_s0  ;;  %36 = vrot.lane.b32.xlu1 %v19_v2, %s99_s12  ;;  %v15_v4 = vld [vmem:[#allocation0 + $0x8] sm:$0xf]  }
   0xb   :  { %13 = vst.msk [vmem:[%s186_s1] ss:$8 sm:$0xf] %vm12_vm0, %v11_v3   ;;  %76 = vst.msk [vmem:[%s186_s1 + $0x20] ss:$8 sm:$0xf] %vm12_vm0, %v15_v4  }
   0xe   :  { %28 = vrot.lane.b32.xlu0 %v19_v2, %s100_s15  ;;  %44 = vrot.lane.b32.xlu1 %v19_v2, %s101_s16 }
  0x12   :  { %52 = vrot.lane.b32.xlu0 %v19_v2, %s102_s17  ;;  %60 = vrot.lane.b32.xlu1 %v19_v2, %s103_s18 }
  0x16   :  { %68 = vrot.lane.b32.xlu0 %v19_v2, %s104_s19 }
  0x7c   :  { %v21_v5 = vpop.permute.xlu0 %20   ;;  %v37_v6 = vpop.permute.xlu1 %36  }
  0x7d   :  { %77 = vst.msk [vmem:[%s186_s1 + $0x1] ss:$8 sm:$0xf] %vm12_vm0, %v21_v5   ;;  %78 = vst.msk [vmem:[%s186_s1 + $0x1] ss:$8 sm:$0xf0] %vm12_vm0, %v21_v5  }
  0x7e   :  { %81 = vst.msk [vmem:[%s186_s1 + $0x3] ss:$8 sm:$0xf] %vm12_vm0, %v37_v6   ;;  %82 = vst.msk [vmem:[%s186_s1 + $0x3] ss:$8 sm:$0xf0] %vm12_vm0, %v37_v6  }
  0x80   :  { %v29_v7 = vpop.permute.xlu0 %28   ;;  %v45_v8 = vpop.permute.xlu1 %44  }
  0x81   :  { %79 = vst.msk [vmem:[%s186_s1 + $0x2] ss:$8 sm:$0xf] %vm12_vm0, %v29_v7   ;;  %80 = vst.msk [vmem:[%s186_s1 + $0x2] ss:$8 sm:$0xf0] %vm12_vm0, %v29_v7  }
  0x82   :  { %83 = vst.msk [vmem:[%s186_s1 + $0x4] ss:$8 sm:$0xf] %vm12_vm0, %v45_v8   ;;  %84 = vst.msk [vmem:[%s186_s1 + $0x4] ss:$8 sm:$0xf0] %vm12_vm0, %v45_v8  }
  0x84   :  { %v53_v9 = vpop.permute.xlu0 %52   ;;  %v61_v10 = vpop.permute.xlu1 %60  }
  0x85   :  { %85 = vst.msk [vmem:[%s186_s1 + $0x5] ss:$8 sm:$0xf] %vm12_vm0, %v53_v9   ;;  %86 = vst.msk [vmem:[%s186_s1 + $0x5] ss:$8 sm:$0xf0] %vm12_vm0, %v53_v9  }
  0x86   :  { %87 = vst.msk [vmem:[%s186_s1 + $0x6] ss:$8 sm:$0xf] %vm12_vm0, %v61_v10   ;;  %88 = vst.msk [vmem:[%s186_s1 + $0x6] ss:$8 sm:$0xf0] %vm12_vm0, %v61_v10  }
  0x88   :  { %v69_v11 = vpop.permute.xlu0 %68  }
  0x89   :  { %89 = vst.msk [vmem:[%s186_s1 + $0x7] ss:$8 sm:$0xf] %vm12_vm0, %v69_v11   ;;  %90 = vst.msk [vmem:[%s186_s1 + $0x7] ss:$8 sm:$0xf0] %vm12_vm0, %v69_v11  }

// kernel: clifford_spectral_conv2d.1
= control target key start
LH: loop header
LB: loop body
LE: loop exit
PB: predicated region body
PF: predicated region fallthrough
CT: control target
= control target key end

     0   :  { %v35_v0 = vlaneseq  ;;  %vm225_vm0 = vcmask 519168   ;;  %s944_s0 = inlined_call_operand.vmem [shape: f32[4,2,4,64], index: 0, kind: input, shape index: {}]   ;;  %s945_s1 = inlined_call_operand.vmem [shape: f32[4,4,4,64], index: 1, kind: input, shape index: {}]   ;;  %s946_s2 = inlined_call_operand.vmem [shape: f32[4,2,4,64], index: 2, kind: output, shape index: {}]  }
   0x1   :  { %v11_v2 = vld [vmem:[%s944_s0] sm:$0xf]  ;;  %v13_v3 = vld [vmem:[%s944_s0 + $0x8] sm:$0xf]  ;;  %v470_v9 = vld [vmem:[%s945_s1 + $0x4] sm:$0xf] }
   0x2   :  { %v36_v1 = vshrl.u32 %v35_v0, 7  ;;  %v465_v8 = vld [vmem:[%s945_s1] sm:$0xf]  ;;  %v475_v10 = vld [vmem:[%s945_s1 + $0x8] sm:$0xf] }
   0x3   :  { %v492_v15 = vld [vmem:[%s945_s1 + $0xc] sm:$0xf]  ;;  %v15_v25 = vld [vmem:[%s944_s0 + $0x10] sm:$0xf]  ;;  %v12_v27 = vld [vmem:[%s944_s0 + $0x4] sm:$0xf] }
   0x4   :  { %v454_v4 = vsub.s32 0, %v36_v1  ;;  %v456_v5 = vsub.s32 1, %v36_v1  ;;  %v458_v6 = vsub.s32 2, %v36_v1  ;;  %v460_v7 = vsub.s32 3, %v36_v1  ;;  %v520_v26 = vld [vmem:[%s945_s1 + $0x10] sm:$0xf] }
   0x5   :  { %982 = vst [vmem:[#allocation5_spill] sm:$0xff] %v520_v26  ;;  %v528_v28 = vld [vmem:[%s945_s1 + $0x14] sm:$0xf]  ;;  %v533_v29 = vld [vmem:[%s945_s1 + $0x18] sm:$0xf] }
   0x6   :  { %v478_v11 = vrot.slane %v11_v2, %v454_v4  ;;  %v481_v12 = vrot.slane %v11_v2, %v456_v5  ;;  %v484_v13 = vrot.slane %v11_v2, %v458_v6  ;;  %v487_v14 = vrot.slane %v11_v2, %v460_v7  ;;  %983 = vst [vmem:[#allocation6_spill] sm:$0xff] %v528_v28  ;;  %v538_v30 = vld [vmem:[%s945_s1 + $0x1c] sm:$0xf]  ;;  %v14_v36 = vld [vmem:[%s944_s0 + $0xc] sm:$0xf] }
   0x7   :  { %v501_v19 = vrot.slane %v13_v3, %v454_v4  ;;  %v504_v20 = vrot.slane %v13_v3, %v456_v5  ;;  %v507_v21 = vrot.slane %v13_v3, %v458_v6  ;;  %v510_v22 = vrot.slane %v13_v3, %v460_v7  ;;  %984 = vst [vmem:[#allocation7_spill] sm:$0xff] %v533_v29  ;;  %v17_v37 = vld [vmem:[%s944_s0 + $0x18] sm:$0xf]  ;;  %v596_v54 = vld [vmem:[%s945_s1 + $0x20] sm:$0xf] }
   0x8   :  { %979 = vst [vmem:[#allocation2_spill] sm:$0xff] %v484_v13  ;;  %980 = vst [vmem:[#allocation3_spill] sm:$0xff] %v487_v14  ;;  %v43_v16 = vmul.f32 %v478_v11, %v465_v8  ;;  %v53_v17 = vmul.f32 %v481_v12, %v470_v9  ;;  %v65_v18 = vmul.f32 %v484_v13, %v475_v10  ;;  %v601_v55 = vld [vmem:[%s945_s1 + $0x24] sm:$0xf]  ;;  %v606_v56 = vld [vmem:[%s945_s1 + $0x28] sm:$0xf] }
   0x9   :  { %981 = vst [vmem:[#allocation4_spill] sm:$0xff] %v510_v22  ;;  %v77_v24 = vmul.f32 %v487_v14, %v492_v15  ;;  %985 = vst [vmem:[#allocation8_spill] sm:$0xff] %v538_v30  ;;  %v89_v32 = vmul.f32 %v501_v19, %v520_v26  ;;  %v101_v33 = vmul.f32 %v504_v20, %v528_v28  ;;  %v616_v61 = vld [vmem:[%s945_s1 + $0x2c] sm:$0xf]  ;;  %v630_v2 = vld [vmem:[%s945_s1 + $0x30] sm:$0xf] }
   0xa   :  { %v55_v23 = vadd.f32 %v53_v17, %v43_v16  ;;  %v113_v34 = vmul.f32 %v507_v21, %v533_v29  ;;  %v125_v35 = vmul.f32 %v510_v22, %v538_v30  ;;  %v555_v39 = vrot.slane %v15_v25, %v454_v4  ;;  %v635_v3 = vld [vmem:[%s945_s1 + $0x34] sm:$0xf] }
   0xb   :  { %v558_v40 = vrot.slane %v12_v27, %v454_v4  ;;  %v561_v41 = vrot.slane %v12_v27, %v456_v5  ;;  %v564_v42 = vrot.slane %v15_v25, %v456_v5  ;;  %v567_v43 = vrot.slane %v15_v25, %v458_v6  ;;  %v16_v17 = vld [vmem:[%s944_s0 + $0x14] sm:$0xf] }
   0xc   :  { %v67_v31 = vadd.f32 %v65_v18, %v55_v23  ;;  %v570_v44 = vrot.slane %v12_v27, %v458_v6  ;;  %v573_v45 = vrot.slane %v12_v27, %v460_v7  ;;  %v580_v49 = vrot.slane %v14_v36, %v454_v4 }
   0xd   :  { %v44_v47 = vmul.f32 %v558_v40, %v465_v8  ;;  %v54_v48 = vmul.f32 %v561_v41, %v470_v9  ;;  %v583_v50 = vrot.slane %v15_v25, %v460_v7  ;;  %v586_v51 = vrot.slane %v17_v37, %v454_v4 }
   0xe   :  { %v79_v38 = vadd.f32 %v77_v24, %v67_v31  ;;  %986 = vst [vmem:[#allocation9_spill] sm:$0xff] %v573_v45  ;;  %v589_v52 = vrot.slane %v17_v37, %v456_v5  ;;  %v66_v53 = vmul.f32 %v570_v44, %v475_v10  ;;  %v78_v59 = vmul.f32 %v573_v45, %v492_v15 }
   0xf   :  { %987 = vst [vmem:[#allocation10_spill] sm:$0xff] %v583_v50  ;;  %988 = vst [vmem:[#allocation11_spill] sm:$0xff] %v586_v51  ;;  %v56_v58 = vadd.f32 %v54_v48, %v44_v47  ;;  %v611_v60 = vrot.slane %v14_v36, %v456_v5  ;;  %v137_v62 = vmul.f32 %v555_v39, %v596_v54 }
  0x10   :  { %v91_v46 = vadd.f32 %v89_v32, %v79_v38  ;;  %989 = vst [vmem:[#allocation12_spill] sm:$0xff] %v589_v52  ;;  %v149_v63 = vmul.f32 %v564_v42, %v601_v55  ;;  %v161_v0 = vmul.f32 %v567_v43, %v606_v56  ;;  %v625_v1 = vrot.slane %v17_v37, %v458_v6 }
  0x11   :  { %v68_v18 = vadd.f32 %v66_v53, %v56_v58  ;;  %v90_v23 = vmul.f32 %v580_v49, %v520_v26  ;;  %v643_v24 = vrot.slane %v14_v36, %v458_v6  ;;  %v173_v25 = vmul.f32 %v583_v50, %v616_v61 }
  0x12   :  { %v103_v57 = vadd.f32 %v101_v33, %v91_v46  ;;  %990 = vst [vmem:[#allocation13_spill] sm:$0xff] %v625_v1  ;;  %v185_v27 = vmul.f32 %v586_v51, %v630_v2  ;;  %v197_v31 = vmul.f32 %v589_v52, %v635_v3  ;;  %v652_v32 = vrot.slane %v17_v37, %v460_v7 }
  0x13   :  { %v102_v38 = vmul.f32 %v611_v60, %v528_v28  ;;  %v657_v46 = vrot.slane %v14_v36, %v460_v7  ;;  %v660_v47 = vrot.slane %v16_v17, %v454_v4  ;;  %v663_v48 = vrot.slane %v16_v17, %v456_v5 }
  0x14   :  { %v115_v16 = vadd.f32 %v113_v34, %v103_v57  ;;  %991 = vst [vmem:[#allocation14_spill] sm:$0xff] %v652_v32  ;;  %v80_v34 = vadd.f32 %v78_v59, %v68_v18  ;;  %v228_v53 = vmul.f32 %v478_v11, %v520_v26  ;;  %v230_v37 = vmul.f32 %v481_v12, %v528_v28 }
  0x15   :  { %992 = vst [vmem:[#allocation15_spill] sm:$0xff] %v657_v46  ;;  %993 = vst [vmem:[#allocation16_spill] sm:$0xff] %v660_v47  ;;  %v114_v58 = vmul.f32 %v643_v24, %v533_v29  ;;  %v677_v59 = vrot.slane %v16_v17, %v458_v6  ;;  %v682_v18 = vrot.slane %v16_v17, %v460_v7 }
  0x16   :  { %v127_v33 = vadd.f32 %v125_v35, %v115_v16  ;;  %v672_v35 = vld [vmem:[%s945_s1 + $0x38] sm:$0xf]  ;;  %v92_v36 = vadd.f32 %v90_v23, %v80_v34  ;;  %v232_v52 = vadd.f32 %v230_v37, %v228_v53  ;;  %v234_v51 = vmul.f32 %v484_v13, %v533_v29 }
  0x17   :  { %994 = vst [vmem:[#allocation17_spill] sm:$0xff] %v677_v59  ;;  %v209_v16 = vmul.f32 %v625_v1, %v672_v35  ;;  %995 = vst [vmem:[#allocation18_spill] sm:$0xff] %v682_v18  ;;  %v126_v1 = vmul.f32 %v657_v46, %v538_v30  ;;  %v238_v17 = vmul.f32 %v487_v14, %v538_v30 }
  0x18   :  { %v139_v57 = vadd.f32 %v137_v62, %v127_v33  ;;  %v689_v62 = vld [vmem:[%s945_s1 + $0x3c] sm:$0xf]  ;;  %v104_v34 = vadd.f32 %v102_v38, %v92_v36  ;;  %v138_v37 = vmul.f32 %v660_v47, %v596_v54  ;;  %v236_v13 = vadd.f32 %v234_v51, %v232_v52 }
  0x19   :  { %v18_v33 = vld [vmem:[%s944_s0 + $0x1c] sm:$0xf]  ;;  %v221_v53 = vmul.f32 %v652_v32, %v689_v62  ;;  %v150_v38 = vmul.f32 %v663_v48, %v601_v55  ;;  %v162_v36 = vmul.f32 %v677_v59, %v606_v56  ;;  %v174_v14 = vmul.f32 %v682_v18, %v616_v61 }
  0x1a   :  { %v151_v23 = vadd.f32 %v149_v63, %v139_v57  ;;  %v242_v63 = vmul.f32 %v501_v19, %v465_v8  ;;  %v116_v50 = vadd.f32 %v114_v58, %v104_v34  ;;  %v711_v32 = vrot.slane %v18_v33, %v454_v4 }
  0x1b   :  { %v240_v47 = vadd.f32 %v238_v17, %v236_v13  ;;  %v246_v51 = vmul.f32 %v504_v20, %v470_v9  ;;  %v716_v58 = vrot.slane %v18_v33, %v456_v5  ;;  %v250_v59 = vmul.f32 %v507_v21, %v475_v10 }
  0x1c   :  { %v163_v57 = vadd.f32 %v161_v0, %v151_v23  ;;  %v128_v0 = vadd.f32 %v126_v1, %v116_v50  ;;  %v719_v23 = vrot.slane %v18_v33, %v458_v6  ;;  %v229_v4 = vmul.f32 %v558_v40, %v520_v26 }
  0x1d   :  { %v244_v34 = vadd.f32 %v242_v63, %v240_v47  ;;  %v231_v13 = vmul.f32 %v561_v41, %v528_v28  ;;  %v728_v50 = vrot.slane %v18_v33, %v460_v7  ;;  %v235_v5 = vmul.f32 %v570_v44, %v533_v29  ;;  %v1001_v29 = vld [vmem:[#allocation16_spill] sm:$0xff] }
  0x1e   :  { %v175_v52 = vadd.f32 %v173_v25, %v163_v57  ;;  %v140_v18 = vadd.f32 %v138_v37, %v128_v0  ;;  %v254_v1 = vmul.f32 %v510_v22, %v492_v15  ;;  %v239_v47 = vmul.f32 %v573_v45, %v538_v30  ;;  %v999_v30 = vld [vmem:[#allocation11_spill] sm:$0xff] }
  0x1f   :  { %v248_v6 = vadd.f32 %v246_v51, %v244_v34  ;;  %v233_v25 = vadd.f32 %v231_v13, %v229_v4  ;;  %v198_v7 = vmul.f32 %v716_v58, %v635_v3  ;;  %v258_v37 = vmul.f32 %v555_v39, %v630_v2 }
  0x20   :  { %v187_v17 = vsub.f32 %v175_v52, %v185_v27  ;;  %v152_v57 = vadd.f32 %v150_v38, %v140_v18  ;;  %v186_v27 = vmul.f32 %v711_v32, %v630_v2  ;;  %v243_v52 = vmul.f32 %v580_v49, %v465_v8 }
  0x21   :  { %v252_v33 = vadd.f32 %v250_v59, %v248_v6  ;;  %v237_v51 = vadd.f32 %v235_v5, %v233_v25  ;;  %v222_v18 = vmul.f32 %v728_v50, %v689_v62  ;;  %v262_v4 = vmul.f32 %v564_v42, %v635_v3 }
  0x22   :  { %v199_v63 = vsub.f32 %v187_v17, %v197_v31  ;;  %v164_v34 = vadd.f32 %v162_v36, %v152_v57  ;;  %v210_v31 = vmul.f32 %v719_v23, %v672_v35  ;;  %v247_v13 = vmul.f32 %v611_v60, %v470_v9 }
  0x23   :  { %v256_v38 = vadd.f32 %v254_v1, %v252_v33  ;;  %v241_v59 = vadd.f32 %v239_v47, %v237_v51  ;;  %v251_v36 = vmul.f32 %v643_v24, %v475_v10  ;;  %v293_v1 = vmul.f32 %v478_v11, %v596_v54  ;;  %v997_v33 = vld [vmem:[#allocation2_spill] sm:$0xff] }
  0x24   :  { %v211_v0 = vsub.f32 %v199_v63, %v209_v16  ;;  %v176_v5 = vadd.f32 %v174_v14, %v164_v34  ;;  %v266_v16 = vmul.f32 %v567_v43, %v672_v35  ;;  %v295_v63 = vmul.f32 %v481_v12, %v601_v55  ;;  %v998_v34 = vld [vmem:[#allocation3_spill] sm:$0xff] }
  0x25   :  { %v260_v6 = vsub.f32 %v256_v38, %v258_v37  ;;  %v245_v25 = vadd.f32 %v243_v52, %v241_v59  ;;  %v255_v57 = vmul.f32 %v657_v46, %v492_v15  ;;  %v299_v37 = vmul.f32 %v997_v33, %v606_v56 }
  0x26   :  { %v223_v17 = vsub.f32 %v211_v0, %v221_v53  ;;  %v188_v14 = vsub.f32 %v176_v5, %v186_v27  ;;  %v996_v53 = vld [vmem:[#allocation10_spill] sm:$0xff]  ;;  %v297_v0 = vadd.f32 %v295_v63, %v293_v1  ;;  %v303_v38 = vmul.f32 %v998_v34, %v616_v61  ;;  %v1000_v27 = vld [vmem:[#allocation12_spill] sm:$0xff] }
  0x27   :  { %v270_v47 = vmul.f32 %v996_v53, %v689_v62  ;;  %v264_v51 = vsub.f32 %v260_v6, %v262_v4  ;;  %v249_v52 = vadd.f32 %v247_v13, %v245_v25  ;;  %v278_v5 = vmul.f32 %v1000_v27, %v601_v55  ;;  %v1002_v6 = vld [vmem:[#allocation13_spill] sm:$0xff] }
  0x28   :  { %226 = vst.msk [vmem:[%s946_s2] sm:$0xf] %vm225_vm0, %v223_v17  ;;  %v200_v59 = vsub.f32 %v188_v14, %v198_v7  ;;  %v274_v17 = vmul.f32 %v999_v30, %v596_v54  ;;  %v259_v28 = vmul.f32 %v1001_v29, %v630_v2  ;;  %v301_v53 = vadd.f32 %v299_v37, %v297_v0  ;;  %v1003_v7 = vld [vmem:[#allocation14_spill] sm:$0xff]  ;;  %v1004_v37 = vld [vmem:[#allocation17_spill] sm:$0xff] }
  0x29   :  { %v268_v26 = vsub.f32 %v264_v51, %v266_v16  ;;  %v253_v46 = vadd.f32 %v251_v36, %v249_v52  ;;  %v307_v4 = vmul.f32 %v501_v19, %v630_v2  ;;  %v282_v25 = vmul.f32 %v1002_v6, %v606_v56 }
  0x2a   :  { %v212_v13 = vsub.f32 %v200_v59, %v210_v31  ;;  %v286_v1 = vmul.f32 %v1003_v7, %v616_v61  ;;  %v263_v63 = vmul.f32 %v663_v48, %v635_v3  ;;  %v305_v30 = vadd.f32 %v303_v38, %v301_v53 }
  0x2b   :  { %v272_v14 = vsub.f32 %v268_v26, %v270_v47  ;;  %v257_v27 = vadd.f32 %v255_v57, %v253_v46  ;;  %v311_v16 = vmul.f32 %v504_v20, %v635_v3  ;;  %v267_v51 = vmul.f32 %v1004_v37, %v672_v35  ;;  %v1005_v46 = vld [vmem:[#allocation18_spill] sm:$0xff] }
  0x2c   :  { %v224_v36 = vsub.f32 %v212_v13, %v222_v18  ;;  %v315_v31 = vmul.f32 %v507_v21, %v672_v35  ;;  %v294_v52 = vmul.f32 %v558_v40, %v596_v54  ;;  %v309_v7 = vadd.f32 %v307_v4, %v305_v30 }
  0x2d   :  { %v276_v0 = vadd.f32 %v274_v17, %v272_v14  ;;  %v261_v59 = vsub.f32 %v257_v27, %v259_v28  ;;  %v296_v26 = vmul.f32 %v561_v41, %v601_v55  ;;  %v271_v18 = vmul.f32 %v1005_v46, %v689_v62 }
  0x2e   :  { %227 = vst.msk [vmem:[%s946_s2 + $0x4] sm:$0xf] %vm225_vm0, %v224_v36  ;;  %v319_v53 = vmul.f32 %v510_v22, %v689_v62  ;;  %v300_v47 = vmul.f32 %v570_v44, %v606_v56  ;;  %v304_v28 = vmul.f32 %v573_v45, %v616_v61  ;;  %v313_v38 = vadd.f32 %v311_v16, %v309_v7 }
  0x2f   :  { %v280_v30 = vadd.f32 %v278_v5, %v276_v0  ;;  %v265_v57 = vsub.f32 %v261_v59, %v263_v63  ;;  %v298_v17 = vadd.f32 %v296_v26, %v294_v52  ;;  %v275_v27 = vmul.f32 %v711_v32, %v596_v54 }
  0x30   :  { %v323_v4 = vmul.f32 %v555_v39, %v465_v8  ;;  %v308_v13 = vmul.f32 %v580_v49, %v630_v2  ;;  %v317_v46 = vadd.f32 %v315_v31, %v313_v38  ;;  %v279_v45 = vmul.f32 %v716_v58, %v601_v55 }
  0x31   :  { %v284_v14 = vadd.f32 %v282_v25, %v280_v30  ;;  %v269_v36 = vsub.f32 %v265_v57, %v267_v51  ;;  %v302_v22 = vadd.f32 %v300_v47, %v298_v17  ;;  %v283_v5 = vmul.f32 %v719_v23, %v606_v56  ;;  %v1006_v47 = vld [vmem:[#allocation10_spill] sm:$0xff]  ;;  %v1007_v17 = vld [vmem:[#allocation15_spill] sm:$0xff] }
  0x32   :  { %v327_v7 = vmul.f32 %v564_v42, %v470_v9  ;;  %v312_v63 = vmul.f32 %v611_v60, %v635_v3  ;;  %v321_v0 = vadd.f32 %v319_v53, %v317_v46  ;;  %v331_v25 = vmul.f32 %v567_v43, %v475_v10 }
  0x33   :  { %v288_v16 = vadd.f32 %v286_v1, %v284_v14  ;;  %v273_v52 = vsub.f32 %v269_v36, %v271_v18  ;;  %v306_v59 = vadd.f32 %v304_v28, %v302_v22  ;;  %v316_v51 = vmul.f32 %v643_v24, %v672_v35 }
  0x34   :  { %v358_v31 = vmul.f32 %v478_v11, %v630_v2  ;;  %v360_v26 = vmul.f32 %v481_v12, %v635_v3  ;;  %v325_v46 = vadd.f32 %v323_v4, %v321_v0  ;;  %v364_v18 = vmul.f32 %v997_v33, %v672_v35  ;;  %v1008_v4 = vld [vmem:[#allocation5_spill] sm:$0xff] }
  0x35   :  { %427 = vst.msk [vmem:[%s946_s2 + $0x8] sm:$0xf] %vm225_vm0, %v288_v16  ;;  %v277_v1 = vadd.f32 %v275_v27, %v273_v52  ;;  %v310_v22 = vadd.f32 %v308_v13, %v306_v59  ;;  %v287_v53 = vmul.f32 %v728_v50, %v616_v61  ;;  %v335_v11 = vmul.f32 %v1006_v47, %v492_v15  ;;  %v1009_v13 = vld [vmem:[#allocation11_spill] sm:$0xff] }
  0x36   :  { %v362_v28 = vadd.f32 %v360_v26, %v358_v31  ;;  %v368_v12 = vmul.f32 %v998_v34, %v689_v62  ;;  %v329_v57 = vadd.f32 %v327_v7, %v325_v46  ;;  %v320_v27 = vmul.f32 %v1007_v17, %v689_v62  ;;  %v1010_v34 = vld [vmem:[#allocation6_spill] sm:$0xff] }
  0x37   :  { %v281_v30 = vadd.f32 %v279_v45, %v277_v1  ;;  %v314_v38 = vadd.f32 %v312_v63, %v310_v22  ;;  %v339_v14 = vmul.f32 %v1009_v13, %v1008_v4  ;;  %v372_v36 = vmul.f32 %v501_v19, %v596_v54  ;;  %v1011_v45 = vld [vmem:[#allocation12_spill] sm:$0xff]  ;;  %v1012_v63 = vld [vmem:[#allocation7_spill] sm:$0xff] }
  0x38   :  { %v366_v33 = vadd.f32 %v364_v18, %v362_v28  ;;  %v333_v52 = vadd.f32 %v331_v25, %v329_v57  ;;  %v324_v59 = vmul.f32 %v1001_v29, %v465_v8  ;;  %v343_v7 = vmul.f32 %v1011_v45, %v1010_v34 }
  0x39   :  { %v285_v16 = vadd.f32 %v283_v5, %v281_v30  ;;  %v318_v0 = vadd.f32 %v316_v51, %v314_v38  ;;  %v347_v31 = vmul.f32 %v1002_v6, %v1012_v63  ;;  %v376_v1 = vmul.f32 %v504_v20, %v601_v55  ;;  %v1013_v30 = vld [vmem:[#allocation4_spill] sm:$0xff] }
  0x3a   :  { %v370_v26 = vadd.f32 %v368_v12, %v366_v33  ;;  %v337_v22 = vadd.f32 %v335_v11, %v333_v52  ;;  %v328_v19 = vmul.f32 %v663_v48, %v470_v9  ;;  %v380_v25 = vmul.f32 %v507_v21, %v606_v56  ;;  %v1015_v38 = vld [vmem:[#allocation8_spill] sm:$0xff] }
  0x3b   :  { %v289_v46 = vadd.f32 %v287_v53, %v285_v16  ;;  %v322_v18 = vadd.f32 %v320_v27, %v318_v0  ;;  %v359_v51 = vmul.f32 %v558_v40, %v630_v2  ;;  %v361_v28 = vmul.f32 %v561_v41, %v635_v3  ;;  %v1014_v41 = vld [vmem:[#allocation9_spill] sm:$0xff]  ;;  %v1016_v27 = vld [vmem:[#allocation14_spill] sm:$0xff] }
  0x3c   :  { %v374_v5 = vadd.f32 %v372_v36, %v370_v26  ;;  %v341_v20 = vsub.f32 %v337_v22, %v339_v14  ;;  %v332_v11 = vmul.f32 %v1004_v37, %v475_v10  ;;  %v365_v12 = vmul.f32 %v570_v44, %v672_v35  ;;  %v1017_v36 = vld [vmem:[#allocation18_spill] sm:$0xff] }
  0x3d   :  { %428 = vst.msk [vmem:[%s946_s2 + $0xc] sm:$0xf] %vm225_vm0, %v289_v46  ;;  %v326_v53 = vadd.f32 %v324_v59, %v322_v18  ;;  %v384_v40 = vmul.f32 %v1013_v30, %v616_v61  ;;  %v363_v2 = vadd.f32 %v361_v28, %v359_v51  ;;  %v369_v3 = vmul.f32 %v1014_v41, %v689_v62 }
  0x3e   :  { %v378_v21 = vadd.f32 %v376_v1, %v374_v5  ;;  %v345_v57 = vsub.f32 %v341_v20, %v343_v7  ;;  %v351_v33 = vmul.f32 %v1016_v27, %v1015_v38  ;;  %v336_v16 = vmul.f32 %v1017_v36, %v492_v15 }
  0x3f   :  { %v330_v14 = vadd.f32 %v328_v19, %v326_v53  ;;  %v388_v44 = vmul.f32 %v555_v39, %v1008_v4  ;;  %v367_v35 = vadd.f32 %v365_v12, %v363_v2  ;;  %v373_v0 = vmul.f32 %v580_v49, %v596_v54 }
  0x40   :  { %v382_v52 = vadd.f32 %v380_v25, %v378_v21  ;;  %v349_v59 = vsub.f32 %v345_v57, %v347_v31  ;;  %v340_v62 = vmul.f32 %v711_v32, %v1008_v4  ;;  %v392_v1 = vmul.f32 %v564_v42, %v1010_v34 }
  0x41   :  { %v334_v26 = vadd.f32 %v332_v11, %v330_v14  ;;  %v371_v46 = vadd.f32 %v369_v3, %v367_v35  ;;  %v377_v22 = vmul.f32 %v611_v60, %v601_v55  ;;  %v344_v39 = vmul.f32 %v716_v58, %v1010_v34 }
  0x42   :  { %v386_v7 = vadd.f32 %v384_v40, %v382_v52  ;;  %v353_v18 = vsub.f32 %v349_v59, %v351_v33  ;;  %v396_v49 = vmul.f32 %v567_v43, %v1012_v63  ;;  %v381_v31 = vmul.f32 %v643_v24, %v606_v56 }
  0x43   :  { %v338_v19 = vadd.f32 %v336_v16, %v334_v26  ;;  %v375_v54 = vadd.f32 %v373_v0, %v371_v46  ;;  %v348_v55 = vmul.f32 %v719_v23, %v1012_v63  ;;  %v400_v25 = vmul.f32 %v1006_v47, %v1015_v38 }
  0x44   :  { %v390_v5 = vsub.f32 %v386_v7, %v388_v44  ;;  %429 = vst.msk [vmem:[%s946_s2 + $0x10] sm:$0xf] %vm225_vm0, %v353_v18  ;;  %v385_v43 = vmul.f32 %v1007_v17, %v616_v61  ;;  %v352_v56 = vmul.f32 %v728_v50, %v1015_v38  ;;  %v404_v20 = vmul.f32 %v1009_v13, %v465_v8 }
  0x45   :  { %v342_v42 = vsub.f32 %v338_v19, %v340_v62  ;;  %v379_v51 = vadd.f32 %v377_v22, %v375_v54  ;;  %v389_v11 = vmul.f32 %v1001_v29, %v1008_v4  ;;  %v408_v47 = vmul.f32 %v1011_v45, %v470_v9 }
  0x46   :  { %v394_v60 = vsub.f32 %v390_v5, %v392_v1  ;;  %v393_v61 = vmul.f32 %v663_v48, %v1010_v34  ;;  %v412_v2 = vmul.f32 %v1002_v6, %v475_v10  ;;  %v397_v13 = vmul.f32 %v1004_v37, %v1012_v63 }
  0x47   :  { %v346_v28 = vsub.f32 %v342_v42, %v344_v39  ;;  %v383_v53 = vadd.f32 %v381_v31, %v379_v51  ;;  %v416_v4 = vmul.f32 %v1016_v27, %v492_v15  ;;  %v401_v48 = vmul.f32 %v1017_v36, %v1015_v38 }
  0x48   :  { %v398_v24 = vsub.f32 %v394_v60, %v396_v49  ;;  %v405_v6 = vmul.f32 %v711_v32, %v465_v8  ;;  %v409_v63 = vmul.f32 %v716_v58, %v470_v9  ;;  %v413_v33 = vmul.f32 %v719_v23, %v475_v10 }
  0x49   :  { %v350_v12 = vsub.f32 %v346_v28, %v348_v55  ;;  %v387_v30 = vadd.f32 %v385_v43, %v383_v53  ;;  %v417_v14 = vmul.f32 %v728_v50, %v492_v15 }
  0x4a   :  { %v402_v21 = vsub.f32 %v398_v24, %v400_v25 }
  0x4b   :  { %v354_v17 = vsub.f32 %v350_v12, %v352_v56  ;;  %v391_v41 = vsub.f32 %v387_v30, %v389_v11 }
  0x4c   :  { %v406_v40 = vadd.f32 %v404_v20, %v402_v21 }
  0x4d   :  { %430 = vst.msk [vmem:[%s946_s2 + $0x14] sm:$0xf] %vm225_vm0, %v354_v17  ;;  %v395_v45 = vsub.f32 %v391_v41, %v393_v61 }
  0x4e   :  { %v410_v29 = vadd.f32 %v408_v47, %v406_v40 }
  0x4f   :  { %v399_v3 = vsub.f32 %v395_v45, %v397_v13 }
  0x50   :  { %v414_v34 = vadd.f32 %v412_v2, %v410_v29 }
  0x51   :  { %v403_v37 = vsub.f32 %v399_v3, %v401_v48 }
  0x52   :  { %v418_v57 = vadd.f32 %v416_v4, %v414_v34 }
  0x53   :  { %v407_v27 = vadd.f32 %v405_v6, %v403_v37 }
  0x54   :  { %431 = vst.msk [vmem:[%s946_s2 + $0x18] sm:$0xf] %vm225_vm0, %v418_v57 }
  0x55   :  { %v411_v38 = vadd.f32 %v409_v63, %v407_v27 }
  0x57   :  { %v415_v36 = vadd.f32 %v413_v33, %v411_v38 }
  0x59   :  { %v419_v8 = vadd.f32 %v417_v14, %v415_v36 }
  0x5b   :  { %432 = vst.msk [vmem:[%s946_s2 + $0x1c] sm:$0xf] %vm225_vm0, %v419_v8 }

// kernel: custom-call
= control target key start
LH: loop header
LB: loop body
LE: loop exit
PB: predicated region body
PF: predicated region fallthrough
CT: control target
= control target key end

     0   :  { %s412_s0 = inlined_call_operand.vmem [shape: f32[2,4,16,16], index: 0, kind: input, shape index: {}]   ;;  %s413_s2 = inlined_call_operand.vmem [shape: c64[2,4,16,16], index: 2, kind: output, shape index: {}]   ;;  %s414_s1 = inlined_call_operand.vmem [shape: f32[2,4,16,16], index: 1, kind: input, shape index: {}]  }
   0x1   :  { %v5_v0 = vld [vmem:[%s412_s0] sm:$0xff]  ;;  %v144_v1 = vld [vmem:[%s412_s0 + $0x8] sm:$0xff]  ;;  %v146_v2 = vld [vmem:[%s412_s0 + $0x10] sm:$0xff] }
   0x2   :  { %6 = vst [vmem:[%s413_s2] sm:$0xff] %v5_v0  ;;  %145 = vst [vmem:[%s413_s2 + $0x8] sm:$0xff] %v144_v1  ;;  %v148_v3 = vld [vmem:[%s412_s0 + $0x18] sm:$0xff]  ;;  %v150_v4 = vld [vmem:[%s412_s0 + $0x20] sm:$0xff] }
   0x3   :  { %147 = vst [vmem:[%s413_s2 + $0x10] sm:$0xff] %v146_v2  ;;  %v152_v5 = vld [vmem:[%s412_s0 + $0x28] sm:$0xff]  ;;  %149 = vst [vmem:[%s413_s2 + $0x18] sm:$0xff] %v148_v3  ;;  %v154_v6 = vld [vmem:[%s412_s0 + $0x30] sm:$0xff] }
   0x4   :  { %151 = vst [vmem:[%s413_s2 + $0x20] sm:$0xff] %v150_v4  ;;  %153 = vst [vmem:[%s413_s2 + $0x28] sm:$0xff] %v152_v5  ;;  %v156_v7 = vld [vmem:[%s412_s0 + $0x38] sm:$0xff]  ;;  %v158_v8 = vld [vmem:[%s412_s0 + $0x40] sm:$0xff] }
   0x5   :  { %155 = vst [vmem:[%s413_s2 + $0x30] sm:$0xff] %v154_v6  ;;  %157 = vst [vmem:[%s413_s2 + $0x38] sm:$0xff] %v156_v7  ;;  %v160_v9 = vld [vmem:[%s412_s0 + $0x48] sm:$0xff]  ;;  %v162_v10 = vld [vmem:[%s412_s0 + $0x50] sm:$0xff] }
   0x6   :  { %159 = vst [vmem:[%s413_s2 + $0x40] sm:$0xff] %v158_v8  ;;  %v164_v11 = vld [vmem:[%s412_s0 + $0x58] sm:$0xff]  ;;  %161 = vst [vmem:[%s413_s2 + $0x48] sm:$0xff] %v160_v9  ;;  %v166_v12 = vld [vmem:[%s412_s0 + $0x60] sm:$0xff] }
   0x7   :  { %163 = vst [vmem:[%s413_s2 + $0x50] sm:$0xff] %v162_v10  ;;  %165 = vst [vmem:[%s413_s2 + $0x58] sm:$0xff] %v164_v11  ;;  %v168_v13 = vld [vmem:[%s412_s0 + $0x68] sm:$0xff]  ;;  %v170_v14 = vld [vmem:[%s412_s0 + $0x70] sm:$0xff] }
   0x8   :  { %167 = vst [vmem:[%s413_s2 + $0x60] sm:$0xff] %v166_v12  ;;  %169 = vst [vmem:[%s413_s2 + $0x68] sm:$0xff] %v168_v13  ;;  %v172_v15 = vld [vmem:[%s412_s0 + $0x78] sm:$0xff]  ;;  %v67_v16 = vld [vmem:[%s414_s1] sm:$0xff] }
   0x9   :  { %171 = vst [vmem:[%s413_s2 + $0x70] sm:$0xff] %v170_v14  ;;  %v175_v17 = vld [vmem:[%s414_s1 + $0x8] sm:$0xff]  ;;  %173 = vst [vmem:[%s413_s2 + $0x78] sm:$0xff] %v172_v15  ;;  %v177_v18 = vld [vmem:[%s414_s1 + $0x10] sm:$0xff] }
   0xa   :  { %174 = vst [vmem:[%s413_s2 + $0x80] sm:$0xff] %v67_v16  ;;  %176 = vst [vmem:[%s413_s2 + $0x88] sm:$0xff] %v175_v17  ;;  %v179_v19 = vld [vmem:[%s414_s1 + $0x18] sm:$0xff]  ;;  %v181_v20 = vld [vmem:[%s414_s1 + $0x20] sm:$0xff] }
   0xb   :  { %178 = vst [vmem:[%s413_s2 + $0x90] sm:$0xff] %v177_v18  ;;  %180 = vst [vmem:[%s413_s2 + $0x98] sm:$0xff] %v179_v19  ;;  %v183_v21 = vld [vmem:[%s414_s1 + $0x28] sm:$0xff]  ;;  %v185_v22 = vld [vmem:[%s414_s1 + $0x30] sm:$0xff] }
   0xc   :  { %182 = vst [vmem:[%s413_s2 + $0xa0] sm:$0xff] %v181_v20  ;;  %v187_v23 = vld [vmem:[%s414_s1 + $0x38] sm:$0xff]  ;;  %184 = vst [vmem:[%s413_s2 + $0xa8] sm:$0xff] %v183_v21  ;;  %v189_v24 = vld [vmem:[%s414_s1 + $0x40] sm:$0xff] }
   0xd   :  { %186 = vst [vmem:[%s413_s2 + $0xb0] sm:$0xff] %v185_v22  ;;  %188 = vst [vmem:[%s413_s2 + $0xb8] sm:$0xff] %v187_v23  ;;  %v191_v25 = vld [vmem:[%s414_s1 + $0x48] sm:$0xff]  ;;  %v193_v26 = vld [vmem:[%s414_s1 + $0x50] sm:$0xff] }
   0xe   :  { %190 = vst [vmem:[%s413_s2 + $0xc0] sm:$0xff] %v189_v24  ;;  %192 = vst [vmem:[%s413_s2 + $0xc8] sm:$0xff] %v191_v25  ;;  %v195_v27 = vld [vmem:[%s414_s1 + $0x58] sm:$0xff]  ;;  %v197_v28 = vld [vmem:[%s414_s1 + $0x60] sm:$0xff] }
   0xf   :  { %194 = vst [vmem:[%s413_s2 + $0xd0] sm:$0xff] %v193_v26  ;;  %v199_v29 = vld [vmem:[%s414_s1 + $0x68] sm:$0xff]  ;;  %196 = vst [vmem:[%s413_s2 + $0xd8] sm:$0xff] %v195_v27  ;;  %v201_v30 = vld [vmem:[%s414_s1 + $0x70] sm:$0xff] }
  0x10   :  { %198 = vst [vmem:[%s413_s2 + $0xe0] sm:$0xff] %v197_v28  ;;  %200 = vst [vmem:[%s413_s2 + $0xe8] sm:$0xff] %v199_v29  ;;  %v203_v31 = vld [vmem:[%s414_s1 + $0x78] sm:$0xff] }
  0x11   :  { %202 = vst [vmem:[%s413_s2 + $0xf0] sm:$0xff] %v201_v30  ;;  %204 = vst [vmem:[%s413_s2 + $0xf8] sm:$0xff] %v203_v31 }

</bundles_post_ra>
